<compile_context>
chip_gen: v6e
topology: v6e:2x2x1
jax: 0.10.0
libtpu: 0.0.40
codegen_flags: <defaults>
</compile_context>

<pallas_src>
import jax
import jax.numpy as jnp
from jax import lax
from jax.experimental import pallas as pl
from jax.experimental.pallas import tpu as pltpu

# ---- small hyperparameters (module uses embed_size=384, block_size=256, etc.;
#      shrunk for a synthetic runnable example) ----
EMBED = 32          # embed_size
N_HEADS = 4         # n_heads
HEAD_SIZE = EMBED // N_HEADS
N_LAYERS = 2        # n_layers
VOCAB = 65          # vocab_size (len(unique_chars))
VOCAB_PAD = 128     # lm_head output padded to a full lane width
BLOCK = 16          # block_size (max context)


# ----------------------------- fused Pallas kernel --------------------------

def _gpt_fused_kernel(x_ref, bias_ref, wqkv_ref, wo_ref, bo_ref,
                      g1_ref, be1_ref, w1_ref, b1_ref, w2_ref, b2_ref,
                      g2_ref, be2_ref, gf_ref, bf_ref, lmw_ref, lmb_ref,
                      o_ref, xs_ref):
    """Whole GPT forward for one batch shard; grid = (batch_shards, n_layers)."""
    l = pl.program_id(1)
    n_layers = pl.num_programs(1)
    Bh, T, E = x_ref.shape
    M = Bh * T

    # Load the residual stream into the resident VMEM scratch at layer 0.
    @pl.when(l == 0)
    def _():
        xs_ref[...] = x_ref[...].reshape(M, E)

    x = xs_ref[...]                                    # (M, E) f32
    bias = bias_ref[...]                               # (T, T) additive causal

    # ---- fused QKV projection for all heads: one (M,E)@(E,3E) matmul ----
    qkv = jnp.dot(x.astype(jnp.bfloat16), wqkv_ref[0],
                  preferred_element_type=jnp.float32)  # (M, 3E) f32

    # ---- causal attention; output projection folded in as per-head accumulate
    wo = wo_ref[0]                                     # (H, hs, E) bf16
    sa_parts = []
    for b in range(Bh):                                # Bh is tiny; static slices
        qkv_b = qkv[b * T:(b + 1) * T]                 # (T, 3E)
        acc = jnp.zeros((T, E), jnp.float32)
        # TODO(perf): at the real T=256 convert this Python unroll to a
        # lax.fori_loop / head-batched dot_general to bound vreg live ranges.
        for h in range(N_HEADS):
            q = qkv_b[:, h*HEAD_SIZE:(h+1)*HEAD_SIZE].astype(jnp.bfloat16)
            k = qkv_b[:, E + h*HEAD_SIZE:E + (h+1)*HEAD_SIZE].astype(jnp.bfloat16)
            v = qkv_b[:, 2*E + h*HEAD_SIZE:2*E + (h+1)*HEAD_SIZE].astype(jnp.bfloat16)
            # 1/sqrt(head_size) is pre-folded into the Q weights.
            s = jnp.dot(q, k.T, preferred_element_type=jnp.float32) + bias
            m = jnp.max(s, axis=-1, keepdims=True)
            p = jnp.exp(s - m)                         # f32 softmax
            p = p * pl.reciprocal(jnp.sum(p, axis=-1, keepdims=True), approx=True)
            ho = jnp.dot(p.astype(jnp.bfloat16), v,
                         preferred_element_type=jnp.float32)      # (T, hs)
            # fold output projection: accumulate ho @ wo[h] (no lane concat)
            acc = acc + jnp.dot(ho.astype(jnp.bfloat16), wo[h],
                                preferred_element_type=jnp.float32)
        sa_parts.append(acc)
    sa = sa_parts[0] if Bh == 1 else jnp.concatenate(sa_parts, axis=0)
    sa = sa + bo_ref[0]                                # (M, E)

    # ---- LayerNorm(x + sa)  (eps=1e-5, biased variance, f32) ----
    h1 = x + sa
    mu1 = jnp.mean(h1, axis=-1, keepdims=True)
    var1 = jnp.mean((h1 - mu1) ** 2, axis=-1, keepdims=True)
    x1 = (h1 - mu1) * lax.rsqrt(var1 + 1e-5) * g1_ref[0] + be1_ref[0]

    # ---- FeedForward: Linear(E,E) -> ReLU -> Linear(E,E) ----
    hm = jnp.dot(x1.astype(jnp.bfloat16), w1_ref[0],
                 preferred_element_type=jnp.float32) + b1_ref[0]
    hm = jnp.maximum(hm, 0.0)
    ff = jnp.dot(hm.astype(jnp.bfloat16), w2_ref[0],
                 preferred_element_type=jnp.float32) + b2_ref[0]

    # ---- LayerNorm(x1 + ff), residual stays resident in VMEM ----
    h2 = x1 + ff
    mu2 = jnp.mean(h2, axis=-1, keepdims=True)
    var2 = jnp.mean((h2 - mu2) ** 2, axis=-1, keepdims=True)
    x2 = (h2 - mu2) * lax.rsqrt(var2 + 1e-5) * g2_ref[0] + be2_ref[0]
    xs_ref[...] = x2

    # ---- after the last layer: fused ln_f + lm_head, lane-dense (128) store --
    @pl.when(l == n_layers - 1)
    def _():
        mu = jnp.mean(x2, axis=-1, keepdims=True)
        var = jnp.mean((x2 - mu) ** 2, axis=-1, keepdims=True)
        xf = (x2 - mu) * lax.rsqrt(var + 1e-5) * gf_ref[...] + bf_ref[...]
        logits = jnp.dot(xf.astype(jnp.bfloat16), lmw_ref[...],
                         preferred_element_type=jnp.float32) + lmb_ref[...]
        o_ref[...] = logits.reshape(Bh, T, VOCAB_PAD)


# ------------------------------ wrapper --------------------------------------

def fused_gpt(x, p):
    """x: (B, T, E) f32 embedded tokens -> padded logits (B, T, VOCAB_PAD)."""
    B, T, E = x.shape
    nsplit = 2 if B % 2 == 0 else 1      # 2-wide "parallel" axis -> both v7x TCs
    Bh = B // nsplit
    L = p["wqkv"].shape[0]

    # Causal additive bias built once in JAX (hoisted out of the kernel body).
    row = lax.broadcasted_iota(jnp.int32, (T, T), 0)
    col = lax.broadcasted_iota(jnp.int32, (T, T), 1)
    bias = jnp.where(col <= row, 0.0, -jnp.inf).astype(jnp.float32)

    def per_layer(shape):
        return pl.BlockSpec((1,) + shape[1:],
                            lambda i, l: (l,) + (0,) * (len(shape) - 1))

    def shared(shape):
        return pl.BlockSpec(shape, lambda i, l: (0,) * len(shape))

    in_specs = [
        pl.BlockSpec((Bh, T, E), lambda i, l: (i, 0, 0)),   # x (batch shard)
        shared(bias.shape),                                  # causal bias
        per_layer(p["wqkv"].shape), per_layer(p["wo"].shape),
        per_layer(p["bo"].shape),
        per_layer(p["ln1_g"].shape), per_layer(p["ln1_b"].shape),
        per_layer(p["w1"].shape), per_layer(p["b1"].shape),
        per_layer(p["w2"].shape), per_layer(p["b2"].shape),
        per_layer(p["ln2_g"].shape), per_layer(p["ln2_b"].shape),
        shared(p["lnf_g"].shape), shared(p["lnf_b"].shape),
        shared(p["lm_w"].shape), shared(p["lm_b"].shape),
    ]
    # TODO(perf): at the real sizes (E=384, T=256, n_layers>=6) set
    # vmem_limit_bytes explicitly and re-budget against v7x's 64 MiB VMEM /
    # v5e's 16 MiB scoped default.
    return pl.pallas_call(
        _gpt_fused_kernel,
        out_shape=jax.ShapeDtypeStruct((B, T, VOCAB_PAD), jnp.float32),
        grid=(nsplit, L),
        in_specs=in_specs,
        out_specs=pl.BlockSpec((Bh, T, VOCAB_PAD), lambda i, l: (i, 0, 0)),
        scratch_shapes=[pltpu.VMEM((Bh * T, E), jnp.float32)],
        compiler_params=pltpu.CompilerParams(
            dimension_semantics=("parallel", "arbitrary")),
    )(x, bias, p["wqkv"], p["wo"], p["bo"], p["ln1_g"], p["ln1_b"],
      p["w1"], p["b1"], p["w2"], p["b2"], p["ln2_g"], p["ln2_b"],
      p["lnf_g"], p["lnf_b"], p["lm_w"], p["lm_b"])


def gpt_forward(ids, params, targets=None):
    B, T = ids.shape
    # token + positional embedding gather kept in plain JAX (glue)
    x = params["tok_emb"][ids] + params["pos_emb"][:T][None, :, :]   # (B, T, E)

    logits_pad = fused_gpt(x, params)            # (B, T, 128), pad cols = -1e9
    logits = logits_pad[:, :, :VOCAB]

    loss = None
    if targets is not None:
        # TODO(synk): cross-entropy kept in plain JAX; computed on the padded
        # (lane-dense) logits — pad columns are at -1e9 so logsumexp ignores them.
        lg = logits_pad.reshape(B * T, VOCAB_PAD)
        tg = targets.reshape(B * T)
        lse = jax.nn.logsumexp(lg, axis=-1)
        loss = jnp.mean(lse - jnp.take_along_axis(lg, tg[:, None], axis=-1)[:, 0])
    return logits, loss


# --------------------------- parameter creation -----------------------------

def init_params(key):
    def nrm(k, shape, scale=0.02):
        return scale * jax.random.normal(k, shape, dtype=jnp.float32)

    keys = jax.random.split(key, 3 + N_LAYERS)

    lm_w = jnp.zeros((EMBED, VOCAB_PAD), jnp.float32)
    lm_w = lm_w.at[:, :VOCAB].set(nrm(keys[2], (EMBED, VOCAB)))
    # padded vocab columns pushed to -1e9 so loss/argmax on padded logits
    # ignore them (real columns [:VOCAB] are unaffected).
    lm_b = jnp.full((1, VOCAB_PAD), -1e9, jnp.float32).at[:, :VOCAB].set(0.0)

    wqkv_l, wo_l, w1_l, w2_l = [], [], [], []
    for li in range(N_LAYERS):
        ks = jax.random.split(keys[3 + li], 6)
        # per-head projection weights (E, hs); attention scale folded into Q
        wq = nrm(ks[0], (N_HEADS, EMBED, HEAD_SIZE)) * (HEAD_SIZE ** -0.5)
        wk = nrm(ks[1], (N_HEADS, EMBED, HEAD_SIZE))
        wv = nrm(ks[2], (N_HEADS, EMBED, HEAD_SIZE))
        to_cols = lambda w: jnp.transpose(w, (1, 0, 2)).reshape(EMBED, EMBED)
        wqkv_l.append(jnp.concatenate(
            [to_cols(wq), to_cols(wk), to_cols(wv)], axis=1))        # (E, 3E)
        # output projection split per head: (H, hs, E)
        wo_l.append(nrm(ks[3], (EMBED, EMBED)).reshape(N_HEADS, HEAD_SIZE, EMBED))
        w1_l.append(nrm(ks[4], (EMBED, EMBED)))
        w2_l.append(nrm(ks[5], (EMBED, EMBED)))

    zeros_le = jnp.zeros((N_LAYERS, 1, EMBED), jnp.float32)
    ones_le = jnp.ones((N_LAYERS, 1, EMBED), jnp.float32)

    return {
        "tok_emb": nrm(keys[0], (VOCAB, EMBED), 1.0),
        "pos_emb": nrm(keys[1], (BLOCK, EMBED), 1.0),
        "wqkv": jnp.stack(wqkv_l).astype(jnp.bfloat16),   # (L, E, 3E)
        "wo": jnp.stack(wo_l).astype(jnp.bfloat16),       # (L, H, hs, E)
        "bo": zeros_le,
        "ln1_g": ones_le, "ln1_b": zeros_le,
        "w1": jnp.stack(w1_l).astype(jnp.bfloat16), "b1": zeros_le,
        "w2": jnp.stack(w2_l).astype(jnp.bfloat16), "b2": zeros_le,
        "ln2_g": ones_le, "ln2_b": zeros_le,
        "lnf_g": jnp.ones((1, EMBED), jnp.float32),
        "lnf_b": jnp.zeros((1, EMBED), jnp.float32),
        "lm_w": lm_w.astype(jnp.bfloat16),                # (E, 128)
        "lm_b": lm_b,                                     # (1, 128)
    }


if __name__ == "__main__":
    key = jax.random.PRNGKey(0)
    pkey, ikey = jax.random.split(key)
    params = init_params(pkey)

    B, T = 2, 8
    ids = jax.random.randint(ikey, (B, T), 0, VOCAB, dtype=jnp.int32)

    logits, loss = gpt_forward(ids, params, targets=None)
    logits = jax.block_until_ready(logits)
    assert logits.shape == (B, T, VOCAB)
    assert loss is None
    print("KERNEL_OK")
</pallas_src>

<mosaic_0001>
module attributes {stable_mosaic.version = 11 : i64} {
  func.func @_gpt_fused_kernel(%arg0: i32, %arg1: i32, %arg2: memref<1x8x32xf32, #tpu.memory_space<vmem>>, %arg3: memref<8x8xf32, #tpu.memory_space<vmem>>, %arg4: memref<1x32x96xbf16, #tpu.memory_space<vmem>>, %arg5: memref<1x4x8x32xbf16, #tpu.memory_space<vmem>>, %arg6: memref<1x1x32xf32, #tpu.memory_space<vmem>>, %arg7: memref<1x1x32xf32, #tpu.memory_space<vmem>>, %arg8: memref<1x1x32xf32, #tpu.memory_space<vmem>>, %arg9: memref<1x32x32xbf16, #tpu.memory_space<vmem>>, %arg10: memref<1x1x32xf32, #tpu.memory_space<vmem>>, %arg11: memref<1x32x32xbf16, #tpu.memory_space<vmem>>, %arg12: memref<1x1x32xf32, #tpu.memory_space<vmem>>, %arg13: memref<1x1x32xf32, #tpu.memory_space<vmem>>, %arg14: memref<1x1x32xf32, #tpu.memory_space<vmem>>, %arg15: memref<1x32xf32, #tpu.memory_space<vmem>>, %arg16: memref<1x32xf32, #tpu.memory_space<vmem>>, %arg17: memref<32x128xbf16, #tpu.memory_space<vmem>>, %arg18: memref<1x128xf32, #tpu.memory_space<vmem>>, %arg19: memref<1x8x128xf32, #tpu.memory_space<vmem>>, %arg20: memref<8x32xf32, #tpu.memory_space<vmem>>) attributes {dimension_semantics = [#tpu.dimension_semantics<parallel>, #tpu.dimension_semantics<arbitrary>], iteration_bounds = array<i64: 2, 2>, scalar_prefetch = 0 : i64, scratch_operands = 1 : i64, tpu.core_type = #tpu.core_type<tc>, window_params = [{transform_indices = @transform_0, window_bounds = array<i64: 1, 8, 32>}, {pipeline_mode = #tpu.pipeline_mode<synchronous>, transform_indices = @transform_1, window_bounds = array<i64: 8, 8>}, {transform_indices = @transform_2, window_bounds = array<i64: 1, 32, 96>}, {transform_indices = @transform_3, window_bounds = array<i64: 1, 4, 8, 32>}, {transform_indices = @transform_4, window_bounds = array<i64: 1, 1, 32>}, {transform_indices = @transform_5, window_bounds = array<i64: 1, 1, 32>}, {transform_indices = @transform_6, window_bounds = array<i64: 1, 1, 32>}, {transform_indices = @transform_7, window_bounds = array<i64: 1, 32, 32>}, {transform_indices = @transform_8, window_bounds = array<i64: 1, 1, 32>}, {transform_indices = @transform_9, window_bounds = array<i64: 1, 32, 32>}, {transform_indices = @transform_10, window_bounds = array<i64: 1, 1, 32>}, {transform_indices = @transform_11, window_bounds = array<i64: 1, 1, 32>}, {transform_indices = @transform_12, window_bounds = array<i64: 1, 1, 32>}, {pipeline_mode = #tpu.pipeline_mode<synchronous>, transform_indices = @transform_13, window_bounds = array<i64: 1, 32>}, {pipeline_mode = #tpu.pipeline_mode<synchronous>, transform_indices = @transform_14, window_bounds = array<i64: 1, 32>}, {pipeline_mode = #tpu.pipeline_mode<synchronous>, transform_indices = @transform_15, window_bounds = array<i64: 32, 128>}, {pipeline_mode = #tpu.pipeline_mode<synchronous>, transform_indices = @transform_16, window_bounds = array<i64: 1, 128>}, {transform_indices = @transform_17, window_bounds = array<i64: 1, 8, 128>}]} {
    %c0_i32 = arith.constant 0 : i32
    %0 = arith.cmpi eq, %arg1, %c0_i32 : i32
    %1 = arith.extui %0 : i1 to i32
    %c0_i32_0 = arith.constant 0 : i32
    %2 = arith.cmpi ne, %1, %c0_i32_0 : i32
    scf.if %2 {
      %c0_75 = arith.constant 0 : index
      %c0_76 = arith.constant 0 : index
      %c0_77 = arith.constant 0 : index
      %196 = vector.load %arg2[%c0_75, %c0_76, %c0_77] : memref<1x8x32xf32, #tpu.memory_space<vmem>>, vector<1x8x32xf32>
      %197 = vector.shape_cast %196 : vector<1x8x32xf32> to vector<8x32xf32>
      %c0_78 = arith.constant 0 : index
      %c0_79 = arith.constant 0 : index
      %198 = vector.load %arg20[%c0_78, %c0_79] : memref<8x32xf32, #tpu.memory_space<vmem>>, vector<8x32xf32>
      tpu.vector_store %arg20[%c0_78, %c0_79], %197 {strides = array<i32>} : memref<8x32xf32, #tpu.memory_space<vmem>>, vector<8x32xf32>,
    } else {
    }
    %c0 = arith.constant 0 : index
    %c0_1 = arith.constant 0 : index
    %3 = vector.load %arg20[%c0, %c0_1] : memref<8x32xf32, #tpu.memory_space<vmem>>, vector<8x32xf32>
    %c0_2 = arith.constant 0 : index
    %c0_3 = arith.constant 0 : index
    %4 = vector.load %arg3[%c0_2, %c0_3] : memref<8x8xf32, #tpu.memory_space<vmem>>, vector<8x8xf32>
    %5 = arith.truncf %3 : vector<8x32xf32> to vector<8x32xbf16>
    %c0_4 = arith.constant 0 : index
    %c0_5 = arith.constant 0 : index
    %c0_6 = arith.constant 0 : index
    %6 = vector.load %arg4[%c0_4, %c0_5, %c0_6] : memref<1x32x96xbf16, #tpu.memory_space<vmem>>, vector<1x32x96xbf16>
    %7 = vector.shape_cast %6 : vector<1x32x96xbf16> to vector<32x96xbf16>
    %cst = arith.constant dense<0.000000e+00> : vector<8x96xf32>
    %8 = tpu.matmul %5, %7, %cst {dimension_numbers = #tpu.dot_dimension_numbers<[1], [0], [0], [1], [0, 0, 1, 1], [], []>} : vector<8x32xbf16>, vector<32x96xbf16>, vector<8x96xf32> -> vector<8x96xf32>
    %c0_7 = arith.constant 0 : index
    %c0_8 = arith.constant 0 : index
    %c0_9 = arith.constant 0 : index
    %c0_10 = arith.constant 0 : index
    %9 = vector.load %arg5[%c0_7, %c0_8, %c0_9, %c0_10] : memref<1x4x8x32xbf16, #tpu.memory_space<vmem>>, vector<1x4x8x32xbf16>
    %10 = vector.shape_cast %9 : vector<1x4x8x32xbf16> to vector<4x8x32xbf16>
    %cst_11 = arith.constant 0.000000e+00 : f32
    %11 = vector.broadcast %cst_11 : f32 to vector<8x32xf32>
    %12 = vector.extract_strided_slice %8 {offsets = [0, 0], sizes = [8, 8], strides = [1, 1]} : vector<8x96xf32> to vector<8x8xf32>
    %13 = arith.truncf %12 : vector<8x8xf32> to vector<8x8xbf16>
    %14 = vector.extract_strided_slice %8 {offsets = [0, 32], sizes = [8, 8], strides = [1, 1]} : vector<8x96xf32> to vector<8x8xf32>
    %15 = arith.truncf %14 : vector<8x8xf32> to vector<8x8xbf16>
    %16 = vector.extract_strided_slice %8 {offsets = [0, 64], sizes = [8, 8], strides = [1, 1]} : vector<8x96xf32> to vector<8x8xf32>
    %17 = arith.truncf %16 : vector<8x8xf32> to vector<8x8xbf16>
    %18 = tpu.transpose %15, [1, 0] : vector<8x8xbf16> -> vector<8x8xbf16>
    %cst_12 = arith.constant dense<0.000000e+00> : vector<8x8xf32>
    %19 = tpu.matmul %13, %18, %cst_12 {dimension_numbers = #tpu.dot_dimension_numbers<[1], [0], [0], [1], [0, 0, 1, 1], [], []>} : vector<8x8xbf16>, vector<8x8xbf16>, vector<8x8xf32> -> vector<8x8xf32>
    %20 = arith.addf %19, %4 : vector<8x8xf32>
    %cst_13 = arith.constant dense<0xFF800000> : vector<8xf32>
    %21 = vector.multi_reduction <maximumf>, %20, %cst_13 [1] : vector<8x8xf32> to vector<8xf32>
    %22 = vector.shape_cast %21 : vector<8xf32> to vector<8x1xf32>
    %23 = vector.broadcast %22 : vector<8x1xf32> to vector<8x8xf32>
    %24 = arith.subf %20, %23 : vector<8x8xf32>
    %25 = math.exp %24 : vector<8x8xf32>
    %cst_14 = arith.constant dense<0.000000e+00> : vector<8xf32>
    %26 = vector.multi_reduction <add>, %25, %cst_14 [1] : vector<8x8xf32> to vector<8xf32>
    %27 = vector.shape_cast %26 : vector<8xf32> to vector<8x1xf32>
    %28 = tpu.reciprocal %27 {approx = true} : vector<8x1xf32> -> vector<8x1xf32>
    %29 = vector.broadcast %28 : vector<8x1xf32> to vector<8x8xf32>
    %30 = arith.mulf %25, %29 : vector<8x8xf32>
    %31 = arith.truncf %30 : vector<8x8xf32> to vector<8x8xbf16>
    %cst_15 = arith.constant dense<0.000000e+00> : vector<8x8xf32>
    %32 = tpu.matmul %31, %17, %cst_15 {dimension_numbers = #tpu.dot_dimension_numbers<[1], [0], [0], [1], [0, 0, 1, 1], [], []>} : vector<8x8xbf16>, vector<8x8xbf16>, vector<8x8xf32> -> vector<8x8xf32>
    %33 = arith.truncf %32 : vector<8x8xf32> to vector<8x8xbf16>
    %34 = vector.extract_strided_slice %10 {offsets = [0, 0, 0], sizes = [1, 8, 32], strides = [1, 1, 1]} : vector<4x8x32xbf16> to vector<1x8x32xbf16>
    %35 = vector.shape_cast %34 : vector<1x8x32xbf16> to vector<8x32xbf16>
    %cst_16 = arith.constant dense<0.000000e+00> : vector<8x32xf32>
    %36 = tpu.matmul %33, %35, %cst_16 {dimension_numbers = #tpu.dot_dimension_numbers<[1], [0], [0], [1], [0, 0, 1, 1], [], []>} : vector<8x8xbf16>, vector<8x32xbf16>, vector<8x32xf32> -> vector<8x32xf32>
    %37 = arith.addf %11, %36 : vector<8x32xf32>
    %38 = vector.extract_strided_slice %8 {offsets = [0, 8], sizes = [8, 8], strides = [1, 1]} : vector<8x96xf32> to vector<8x8xf32>
    %39 = arith.truncf %38 : vector<8x8xf32> to vector<8x8xbf16>
    %40 = vector.extract_strided_slice %8 {offsets = [0, 40], sizes = [8, 8], strides = [1, 1]} : vector<8x96xf32> to vector<8x8xf32>
    %41 = arith.truncf %40 : vector<8x8xf32> to vector<8x8xbf16>
    %42 = vector.extract_strided_slice %8 {offsets = [0, 72], sizes = [8, 8], strides = [1, 1]} : vector<8x96xf32> to vector<8x8xf32>
    %43 = arith.truncf %42 : vector<8x8xf32> to vector<8x8xbf16>
    %44 = tpu.transpose %41, [1, 0] : vector<8x8xbf16> -> vector<8x8xbf16>
    %cst_17 = arith.constant dense<0.000000e+00> : vector<8x8xf32>
    %45 = tpu.matmul %39, %44, %cst_17 {dimension_numbers = #tpu.dot_dimension_numbers<[1], [0], [0], [1], [0, 0, 1, 1], [], []>} : vector<8x8xbf16>, vector<8x8xbf16>, vector<8x8xf32> -> vector<8x8xf32>
    %46 = arith.addf %45, %4 : vector<8x8xf32>
    %cst_18 = arith.constant dense<0xFF800000> : vector<8xf32>
    %47 = vector.multi_reduction <maximumf>, %46, %cst_18 [1] : vector<8x8xf32> to vector<8xf32>
    %48 = vector.shape_cast %47 : vector<8xf32> to vector<8x1xf32>
    %49 = vector.broadcast %48 : vector<8x1xf32> to vector<8x8xf32>
    %50 = arith.subf %46, %49 : vector<8x8xf32>
    %51 = math.exp %50 : vector<8x8xf32>
    %cst_19 = arith.constant dense<0.000000e+00> : vector<8xf32>
    %52 = vector.multi_reduction <add>, %51, %cst_19 [1] : vector<8x8xf32> to vector<8xf32>
    %53 = vector.shape_cast %52 : vector<8xf32> to vector<8x1xf32>
    %54 = tpu.reciprocal %53 {approx = true} : vector<8x1xf32> -> vector<8x1xf32>
    %55 = vector.broadcast %54 : vector<8x1xf32> to vector<8x8xf32>
    %56 = arith.mulf %51, %55 : vector<8x8xf32>
    %57 = arith.truncf %56 : vector<8x8xf32> to vector<8x8xbf16>
    %cst_20 = arith.constant dense<0.000000e+00> : vector<8x8xf32>
    %58 = tpu.matmul %57, %43, %cst_20 {dimension_numbers = #tpu.dot_dimension_numbers<[1], [0], [0], [1], [0, 0, 1, 1], [], []>} : vector<8x8xbf16>, vector<8x8xbf16>, vector<8x8xf32> -> vector<8x8xf32>
    %59 = arith.truncf %58 : vector<8x8xf32> to vector<8x8xbf16>
    %60 = vector.extract_strided_slice %10 {offsets = [1, 0, 0], sizes = [1, 8, 32], strides = [1, 1, 1]} : vector<4x8x32xbf16> to vector<1x8x32xbf16>
    %61 = vector.shape_cast %60 : vector<1x8x32xbf16> to vector<8x32xbf16>
    %cst_21 = arith.constant dense<0.000000e+00> : vector<8x32xf32>
    %62 = tpu.matmul %59, %61, %cst_21 {dimension_numbers = #tpu.dot_dimension_numbers<[1], [0], [0], [1], [0, 0, 1, 1], [], []>} : vector<8x8xbf16>, vector<8x32xbf16>, vector<8x32xf32> -> vector<8x32xf32>
    %63 = arith.addf %37, %62 : vector<8x32xf32>
    %64 = vector.extract_strided_slice %8 {offsets = [0, 16], sizes = [8, 8], strides = [1, 1]} : vector<8x96xf32> to vector<8x8xf32>
    %65 = arith.truncf %64 : vector<8x8xf32> to vector<8x8xbf16>
    %66 = vector.extract_strided_slice %8 {offsets = [0, 48], sizes = [8, 8], strides = [1, 1]} : vector<8x96xf32> to vector<8x8xf32>
    %67 = arith.truncf %66 : vector<8x8xf32> to vector<8x8xbf16>
    %68 = vector.extract_strided_slice %8 {offsets = [0, 80], sizes = [8, 8], strides = [1, 1]} : vector<8x96xf32> to vector<8x8xf32>
    %69 = arith.truncf %68 : vector<8x8xf32> to vector<8x8xbf16>
    %70 = tpu.transpose %67, [1, 0] : vector<8x8xbf16> -> vector<8x8xbf16>
    %cst_22 = arith.constant dense<0.000000e+00> : vector<8x8xf32>
    %71 = tpu.matmul %65, %70, %cst_22 {dimension_numbers = #tpu.dot_dimension_numbers<[1], [0], [0], [1], [0, 0, 1, 1], [], []>} : vector<8x8xbf16>, vector<8x8xbf16>, vector<8x8xf32> -> vector<8x8xf32>
    %72 = arith.addf %71, %4 : vector<8x8xf32>
    %cst_23 = arith.constant dense<0xFF800000> : vector<8xf32>
    %73 = vector.multi_reduction <maximumf>, %72, %cst_23 [1] : vector<8x8xf32> to vector<8xf32>
    %74 = vector.shape_cast %73 : vector<8xf32> to vector<8x1xf32>
    %75 = vector.broadcast %74 : vector<8x1xf32> to vector<8x8xf32>
    %76 = arith.subf %72, %75 : vector<8x8xf32>
    %77 = math.exp %76 : vector<8x8xf32>
    %cst_24 = arith.constant dense<0.000000e+00> : vector<8xf32>
    %78 = vector.multi_reduction <add>, %77, %cst_24 [1] : vector<8x8xf32> to vector<8xf32>
    %79 = vector.shape_cast %78 : vector<8xf32> to vector<8x1xf32>
    %80 = tpu.reciprocal %79 {approx = true} : vector<8x1xf32> -> vector<8x1xf32>
    %81 = vector.broadcast %80 : vector<8x1xf32> to vector<8x8xf32>
    %82 = arith.mulf %77, %81 : vector<8x8xf32>
    %83 = arith.truncf %82 : vector<8x8xf32> to vector<8x8xbf16>
    %cst_25 = arith.constant dense<0.000000e+00> : vector<8x8xf32>
    %84 = tpu.matmul %83, %69, %cst_25 {dimension_numbers = #tpu.dot_dimension_numbers<[1], [0], [0], [1], [0, 0, 1, 1], [], []>} : vector<8x8xbf16>, vector<8x8xbf16>, vector<8x8xf32> -> vector<8x8xf32>
    %85 = arith.truncf %84 : vector<8x8xf32> to vector<8x8xbf16>
    %86 = vector.extract_strided_slice %10 {offsets = [2, 0, 0], sizes = [1, 8, 32], strides = [1, 1, 1]} : vector<4x8x32xbf16> to vector<1x8x32xbf16>
    %87 = vector.shape_cast %86 : vector<1x8x32xbf16> to vector<8x32xbf16>
    %cst_26 = arith.constant dense<0.000000e+00> : vector<8x32xf32>
    %88 = tpu.matmul %85, %87, %cst_26 {dimension_numbers = #tpu.dot_dimension_numbers<[1], [0], [0], [1], [0, 0, 1, 1], [], []>} : vector<8x8xbf16>, vector<8x32xbf16>, vector<8x32xf32> -> vector<8x32xf32>
    %89 = arith.addf %63, %88 : vector<8x32xf32>
    %90 = vector.extract_strided_slice %8 {offsets = [0, 24], sizes = [8, 8], strides = [1, 1]} : vector<8x96xf32> to vector<8x8xf32>
    %91 = arith.truncf %90 : vector<8x8xf32> to vector<8x8xbf16>
    %92 = vector.extract_strided_slice %8 {offsets = [0, 56], sizes = [8, 8], strides = [1, 1]} : vector<8x96xf32> to vector<8x8xf32>
    %93 = arith.truncf %92 : vector<8x8xf32> to vector<8x8xbf16>
    %94 = vector.extract_strided_slice %8 {offsets = [0, 88], sizes = [8, 8], strides = [1, 1]} : vector<8x96xf32> to vector<8x8xf32>
    %95 = arith.truncf %94 : vector<8x8xf32> to vector<8x8xbf16>
    %96 = tpu.transpose %93, [1, 0] : vector<8x8xbf16> -> vector<8x8xbf16>
    %cst_27 = arith.constant dense<0.000000e+00> : vector<8x8xf32>
    %97 = tpu.matmul %91, %96, %cst_27 {dimension_numbers = #tpu.dot_dimension_numbers<[1], [0], [0], [1], [0, 0, 1, 1], [], []>} : vector<8x8xbf16>, vector<8x8xbf16>, vector<8x8xf32> -> vector<8x8xf32>
    %98 = arith.addf %97, %4 : vector<8x8xf32>
    %cst_28 = arith.constant dense<0xFF800000> : vector<8xf32>
    %99 = vector.multi_reduction <maximumf>, %98, %cst_28 [1] : vector<8x8xf32> to vector<8xf32>
    %100 = vector.shape_cast %99 : vector<8xf32> to vector<8x1xf32>
    %101 = vector.broadcast %100 : vector<8x1xf32> to vector<8x8xf32>
    %102 = arith.subf %98, %101 : vector<8x8xf32>
    %103 = math.exp %102 : vector<8x8xf32>
    %cst_29 = arith.constant dense<0.000000e+00> : vector<8xf32>
    %104 = vector.multi_reduction <add>, %103, %cst_29 [1] : vector<8x8xf32> to vector<8xf32>
    %105 = vector.shape_cast %104 : vector<8xf32> to vector<8x1xf32>
    %106 = tpu.reciprocal %105 {approx = true} : vector<8x1xf32> -> vector<8x1xf32>
    %107 = vector.broadcast %106 : vector<8x1xf32> to vector<8x8xf32>
    %108 = arith.mulf %103, %107 : vector<8x8xf32>
    %109 = arith.truncf %108 : vector<8x8xf32> to vector<8x8xbf16>
    %cst_30 = arith.constant dense<0.000000e+00> : vector<8x8xf32>
    %110 = tpu.matmul %109, %95, %cst_30 {dimension_numbers = #tpu.dot_dimension_numbers<[1], [0], [0], [1], [0, 0, 1, 1], [], []>} : vector<8x8xbf16>, vector<8x8xbf16>, vector<8x8xf32> -> vector<8x8xf32>
    %111 = arith.truncf %110 : vector<8x8xf32> to vector<8x8xbf16>
    %112 = vector.extract_strided_slice %10 {offsets = [3, 0, 0], sizes = [1, 8, 32], strides = [1, 1, 1]} : vector<4x8x32xbf16> to vector<1x8x32xbf16>
    %113 = vector.shape_cast %112 : vector<1x8x32xbf16> to vector<8x32xbf16>
    %cst_31 = arith.constant dense<0.000000e+00> : vector<8x32xf32>
    %114 = tpu.matmul %111, %113, %cst_31 {dimension_numbers = #tpu.dot_dimension_numbers<[1], [0], [0], [1], [0, 0, 1, 1], [], []>} : vector<8x8xbf16>, vector<8x32xbf16>, vector<8x32xf32> -> vector<8x32xf32>
    %115 = arith.addf %89, %114 : vector<8x32xf32>
    %c0_32 = arith.constant 0 : index
    %c0_33 = arith.constant 0 : index
    %c0_34 = arith.constant 0 : index
    %116 = vector.load %arg6[%c0_32, %c0_33, %c0_34] : memref<1x1x32xf32, #tpu.memory_space<vmem>>, vector<1x1x32xf32>
    %117 = vector.shape_cast %116 : vector<1x1x32xf32> to vector<1x32xf32>
    %118 = vector.broadcast %117 : vector<1x32xf32> to vector<8x32xf32>
    %119 = arith.addf %115, %118 : vector<8x32xf32>
    %120 = arith.addf %3, %119 : vector<8x32xf32>
    %cst_35 = arith.constant dense<0.000000e+00> : vector<8xf32>
    %121 = vector.multi_reduction <add>, %120, %cst_35 [1] : vector<8x32xf32> to vector<8xf32>
    %122 = vector.shape_cast %121 : vector<8xf32> to vector<8x1xf32>
    %cst_36 = arith.constant 3.200000e+01 : f32
    %123 = vector.broadcast %cst_36 : f32 to vector<8x1xf32>
    %124 = arith.divf %122, %123 : vector<8x1xf32>
    %125 = vector.broadcast %124 : vector<8x1xf32> to vector<8x32xf32>
    %126 = arith.subf %120, %125 : vector<8x32xf32>
    %127 = arith.mulf %126, %126 : vector<8x32xf32>
    %cst_37 = arith.constant dense<0.000000e+00> : vector<8xf32>
    %128 = vector.multi_reduction <add>, %127, %cst_37 [1] : vector<8x32xf32> to vector<8xf32>
    %129 = vector.shape_cast %128 : vector<8xf32> to vector<8x1xf32>
    %cst_38 = arith.constant 3.200000e+01 : f32
    %130 = vector.broadcast %cst_38 : f32 to vector<8x1xf32>
    %131 = arith.divf %129, %130 : vector<8x1xf32>
    %132 = vector.broadcast %124 : vector<8x1xf32> to vector<8x32xf32>
    %133 = arith.subf %120, %132 : vector<8x32xf32>
    %cst_39 = arith.constant 9.99999974E-6 : f32
    %134 = vector.broadcast %cst_39 : f32 to vector<8x1xf32>
    %135 = arith.addf %131, %134 : vector<8x1xf32>
    %136 = math.rsqrt %135 : vector<8x1xf32>
    %137 = vector.broadcast %136 : vector<8x1xf32> to vector<8x32xf32>
    %138 = arith.mulf %133, %137 : vector<8x32xf32>
    %c0_40 = arith.constant 0 : index
    %c0_41 = arith.constant 0 : index
    %c0_42 = arith.constant 0 : index
    %139 = vector.load %arg7[%c0_40, %c0_41, %c0_42] : memref<1x1x32xf32, #tpu.memory_space<vmem>>, vector<1x1x32xf32>
    %140 = vector.shape_cast %139 : vector<1x1x32xf32> to vector<1x32xf32>
    %141 = vector.broadcast %140 : vector<1x32xf32> to vector<8x32xf32>
    %142 = arith.mulf %138, %141 : vector<8x32xf32>
    %c0_43 = arith.constant 0 : index
    %c0_44 = arith.constant 0 : index
    %c0_45 = arith.constant 0 : index
    %143 = vector.load %arg8[%c0_43, %c0_44, %c0_45] : memref<1x1x32xf32, #tpu.memory_space<vmem>>, vector<1x1x32xf32>
    %144 = vector.shape_cast %143 : vector<1x1x32xf32> to vector<1x32xf32>
    %145 = vector.broadcast %144 : vector<1x32xf32> to vector<8x32xf32>
    %146 = arith.addf %142, %145 : vector<8x32xf32>
    %147 = arith.truncf %146 : vector<8x32xf32> to vector<8x32xbf16>
    %c0_46 = arith.constant 0 : index
    %c0_47 = arith.constant 0 : index
    %c0_48 = arith.constant 0 : index
    %148 = vector.load %arg9[%c0_46, %c0_47, %c0_48] : memref<1x32x32xbf16, #tpu.memory_space<vmem>>, vector<1x32x32xbf16>
    %149 = vector.shape_cast %148 : vector<1x32x32xbf16> to vector<32x32xbf16>
    %cst_49 = arith.constant dense<0.000000e+00> : vector<8x32xf32>
    %150 = tpu.matmul %147, %149, %cst_49 {dimension_numbers = #tpu.dot_dimension_numbers<[1], [0], [0], [1], [0, 0, 1, 1], [], []>} : vector<8x32xbf16>, vector<32x32xbf16>, vector<8x32xf32> -> vector<8x32xf32>
    %c0_50 = arith.constant 0 : index
    %c0_51 = arith.constant 0 : index
    %c0_52 = arith.constant 0 : index
    %151 = vector.load %arg10[%c0_50, %c0_51, %c0_52] : memref<1x1x32xf32, #tpu.memory_space<vmem>>, vector<1x1x32xf32>
    %152 = vector.shape_cast %151 : vector<1x1x32xf32> to vector<1x32xf32>
    %153 = vector.broadcast %152 : vector<1x32xf32> to vector<8x32xf32>
    %154 = arith.addf %150, %153 : vector<8x32xf32>
    %cst_53 = arith.constant 0.000000e+00 : f32
    %155 = vector.broadcast %cst_53 : f32 to vector<8x32xf32>
    %156 = arith.maximumf %154, %155 : vector<8x32xf32>
    %157 = arith.truncf %156 : vector<8x32xf32> to vector<8x32xbf16>
    %c0_54 = arith.constant 0 : index
    %c0_55 = arith.constant 0 : index
    %c0_56 = arith.constant 0 : index
    %158 = vector.load %arg11[%c0_54, %c0_55, %c0_56] : memref<1x32x32xbf16, #tpu.memory_space<vmem>>, vector<1x32x32xbf16>
    %159 = vector.shape_cast %158 : vector<1x32x32xbf16> to vector<32x32xbf16>
    %cst_57 = arith.constant dense<0.000000e+00> : vector<8x32xf32>
    %160 = tpu.matmul %157, %159, %cst_57 {dimension_numbers = #tpu.dot_dimension_numbers<[1], [0], [0], [1], [0, 0, 1, 1], [], []>} : vector<8x32xbf16>, vector<32x32xbf16>, vector<8x32xf32> -> vector<8x32xf32>
    %c0_58 = arith.constant 0 : index
    %c0_59 = arith.constant 0 : index
    %c0_60 = arith.constant 0 : index
    %161 = vector.load %arg12[%c0_58, %c0_59, %c0_60] : memref<1x1x32xf32, #tpu.memory_space<vmem>>, vector<1x1x32xf32>
    %162 = vector.shape_cast %161 : vector<1x1x32xf32> to vector<1x32xf32>
    %163 = vector.broadcast %162 : vector<1x32xf32> to vector<8x32xf32>
    %164 = arith.addf %160, %163 : vector<8x32xf32>
    %165 = arith.addf %146, %164 : vector<8x32xf32>
    %cst_61 = arith.constant dense<0.000000e+00> : vector<8xf32>
    %166 = vector.multi_reduction <add>, %165, %cst_61 [1] : vector<8x32xf32> to vector<8xf32>
    %167 = vector.shape_cast %166 : vector<8xf32> to vector<8x1xf32>
    %cst_62 = arith.constant 3.200000e+01 : f32
    %168 = vector.broadcast %cst_62 : f32 to vector<8x1xf32>
    %169 = arith.divf %167, %168 : vector<8x1xf32>
    %170 = vector.broadcast %169 : vector<8x1xf32> to vector<8x32xf32>
    %171 = arith.subf %165, %170 : vector<8x32xf32>
    %172 = arith.mulf %171, %171 : vector<8x32xf32>
    %cst_63 = arith.constant dense<0.000000e+00> : vector<8xf32>
    %173 = vector.multi_reduction <add>, %172, %cst_63 [1] : vector<8x32xf32> to vector<8xf32>
    %174 = vector.shape_cast %173 : vector<8xf32> to vector<8x1xf32>
    %cst_64 = arith.constant 3.200000e+01 : f32
    %175 = vector.broadcast %cst_64 : f32 to vector<8x1xf32>
    %176 = arith.divf %174, %175 : vector<8x1xf32>
    %177 = vector.broadcast %169 : vector<8x1xf32> to vector<8x32xf32>
    %178 = arith.subf %165, %177 : vector<8x32xf32>
    %cst_65 = arith.constant 9.99999974E-6 : f32
    %179 = vector.broadcast %cst_65 : f32 to vector<8x1xf32>
    %180 = arith.addf %176, %179 : vector<8x1xf32>
    %181 = math.rsqrt %180 : vector<8x1xf32>
    %182 = vector.broadcast %181 : vector<8x1xf32> to vector<8x32xf32>
    %183 = arith.mulf %178, %182 : vector<8x32xf32>
    %c0_66 = arith.constant 0 : index
    %c0_67 = arith.constant 0 : index
    %c0_68 = arith.constant 0 : index
    %184 = vector.load %arg13[%c0_66, %c0_67, %c0_68] : memref<1x1x32xf32, #tpu.memory_space<vmem>>, vector<1x1x32xf32>
    %185 = vector.shape_cast %184 : vector<1x1x32xf32> to vector<1x32xf32>
    %186 = vector.broadcast %185 : vector<1x32xf32> to vector<8x32xf32>
    %187 = arith.mulf %183, %186 : vector<8x32xf32>
    %c0_69 = arith.constant 0 : index
    %c0_70 = arith.constant 0 : index
    %c0_71 = arith.constant 0 : index
    %188 = vector.load %arg14[%c0_69, %c0_70, %c0_71] : memref<1x1x32xf32, #tpu.memory_space<vmem>>, vector<1x1x32xf32>
    %189 = vector.shape_cast %188 : vector<1x1x32xf32> to vector<1x32xf32>
    %190 = vector.broadcast %189 : vector<1x32xf32> to vector<8x32xf32>
    %191 = arith.addf %187, %190 : vector<8x32xf32>
    %c0_72 = arith.constant 0 : index
    %c0_73 = arith.constant 0 : index
    %192 = vector.load %arg20[%c0_72, %c0_73] : memref<8x32xf32, #tpu.memory_space<vmem>>, vector<8x32xf32>
    tpu.vector_store %arg20[%c0_72, %c0_73], %191 {strides = array<i32>} : memref<8x32xf32, #tpu.memory_space<vmem>>, vector<8x32xf32>,
    %c1_i32 = arith.constant 1 : i32
    %193 = arith.cmpi eq, %arg1, %c1_i32 : i32
    %194 = arith.extui %193 : i1 to i32
    %c0_i32_74 = arith.constant 0 : i32
    %195 = arith.cmpi ne, %194, %c0_i32_74 : i32
    scf.if %195 {
      %cst_75 = arith.constant dense<0.000000e+00> : vector<8xf32>
      %196 = vector.multi_reduction <add>, %191, %cst_75 [1] : vector<8x32xf32> to vector<8xf32>
      %197 = vector.shape_cast %196 : vector<8xf32> to vector<8x1xf32>
      %cst_76 = arith.constant 3.200000e+01 : f32
      %198 = vector.broadcast %cst_76 : f32 to vector<8x1xf32>
      %199 = arith.divf %197, %198 : vector<8x1xf32>
      %200 = vector.broadcast %199 : vector<8x1xf32> to vector<8x32xf32>
      %201 = arith.subf %191, %200 : vector<8x32xf32>
      %202 = arith.mulf %201, %201 : vector<8x32xf32>
      %cst_77 = arith.constant dense<0.000000e+00> : vector<8xf32>
      %203 = vector.multi_reduction <add>, %202, %cst_77 [1] : vector<8x32xf32> to vector<8xf32>
      %204 = vector.shape_cast %203 : vector<8xf32> to vector<8x1xf32>
      %cst_78 = arith.constant 3.200000e+01 : f32
      %205 = vector.broadcast %cst_78 : f32 to vector<8x1xf32>
      %206 = arith.divf %204, %205 : vector<8x1xf32>
      %207 = vector.broadcast %199 : vector<8x1xf32> to vector<8x32xf32>
      %208 = arith.subf %191, %207 : vector<8x32xf32>
      %cst_79 = arith.constant 9.99999974E-6 : f32
      %209 = vector.broadcast %cst_79 : f32 to vector<8x1xf32>
      %210 = arith.addf %206, %209 : vector<8x1xf32>
      %211 = math.rsqrt %210 : vector<8x1xf32>
      %212 = vector.broadcast %211 : vector<8x1xf32> to vector<8x32xf32>
      %213 = arith.mulf %208, %212 : vector<8x32xf32>
      %c0_80 = arith.constant 0 : index
      %c0_81 = arith.constant 0 : index
      %214 = vector.load %arg15[%c0_80, %c0_81] : memref<1x32xf32, #tpu.memory_space<vmem>>, vector<1x32xf32>
      %215 = vector.broadcast %214 : vector<1x32xf32> to vector<8x32xf32>
      %216 = arith.mulf %213, %215 : vector<8x32xf32>
      %c0_82 = arith.constant 0 : index
      %c0_83 = arith.constant 0 : index
      %217 = vector.load %arg16[%c0_82, %c0_83] : memref<1x32xf32, #tpu.memory_space<vmem>>, vector<1x32xf32>
      %218 = vector.broadcast %217 : vector<1x32xf32> to vector<8x32xf32>
      %219 = arith.addf %216, %218 : vector<8x32xf32>
      %220 = arith.truncf %219 : vector<8x32xf32> to vector<8x32xbf16>
      %c0_84 = arith.constant 0 : index
      %c0_85 = arith.constant 0 : index
      %221 = vector.load %arg17[%c0_84, %c0_85] : memref<32x128xbf16, #tpu.memory_space<vmem>>, vector<32x128xbf16>
      %cst_86 = arith.constant dense<0.000000e+00> : vector<8x128xf32>
      %222 = tpu.matmul %220, %221, %cst_86 {dimension_numbers = #tpu.dot_dimension_numbers<[1], [0], [0], [1], [0, 0, 1, 1], [], []>} : vector<8x32xbf16>, vector<32x128xbf16>, vector<8x128xf32> -> vector<8x128xf32>
      %c0_87 = arith.constant 0 : index
      %c0_88 = arith.constant 0 : index
      %223 = vector.load %arg18[%c0_87, %c0_88] : memref<1x128xf32, #tpu.memory_space<vmem>>, vector<1x128xf32>
      %224 = vector.broadcast %223 : vector<1x128xf32> to vector<8x128xf32>
      %225 = arith.addf %222, %224 : vector<8x128xf32>
      %226 = vector.shape_cast %225 : vector<8x128xf32> to vector<1x8x128xf32>
      %c0_89 = arith.constant 0 : index
      %c0_90 = arith.constant 0 : index
      %c0_91 = arith.constant 0 : index
      %227 = vector.load %arg19[%c0_89, %c0_90, %c0_91] : memref<1x8x128xf32, #tpu.memory_space<vmem>>, vector<1x8x128xf32>
      tpu.vector_store %arg19[%c0_89, %c0_90, %c0_91], %226 {strides = array<i32>} : memref<1x8x128xf32, #tpu.memory_space<vmem>>, vector<1x8x128xf32>,
    } else {
    }
    return
  }
  func.func @transform_0(%arg0: i32, %arg1: i32) -> (i32, i32, i32) {
    %c0_i32 = arith.constant 0 : i32
    %c0_i32_0 = arith.constant 0 : i32
    %c0_i32_1 = arith.constant 0 : i32
    return %arg0, %c0_i32, %c0_i32_0 : i32, i32, i32
  }
  func.func @transform_1(%arg0: i32, %arg1: i32) -> (i32, i32) {
    %c0_i32 = arith.constant 0 : i32
    %c0_i32_0 = arith.constant 0 : i32
    %c0_i32_1 = arith.constant 0 : i32
    return %c0_i32, %c0_i32_0 : i32, i32
  }
  func.func @transform_2(%arg0: i32, %arg1: i32) -> (i32, i32, i32) {
    %c0_i32 = arith.constant 0 : i32
    %c0_i32_0 = arith.constant 0 : i32
    %c0_i32_1 = arith.constant 0 : i32
    return %arg1, %c0_i32, %c0_i32_0 : i32, i32, i32
  }
  func.func @transform_3(%arg0: i32, %arg1: i32) -> (i32, i32, i32, i32) {
    %c0_i32 = arith.constant 0 : i32
    %c0_i32_0 = arith.constant 0 : i32
    %c0_i32_1 = arith.constant 0 : i32
    %c0_i32_2 = arith.constant 0 : i32
    return %arg1, %c0_i32, %c0_i32_0, %c0_i32_1 : i32, i32, i32, i32
  }
  func.func @transform_4(%arg0: i32, %arg1: i32) -> (i32, i32, i32) {
    %c0_i32 = arith.constant 0 : i32
    %c0_i32_0 = arith.constant 0 : i32
    %c0_i32_1 = arith.constant 0 : i32
    return %arg1, %c0_i32, %c0_i32_0 : i32, i32, i32
  }
  func.func @transform_5(%arg0: i32, %arg1: i32) -> (i32, i32, i32) {
    %c0_i32 = arith.constant 0 : i32
    %c0_i32_0 = arith.constant 0 : i32
    %c0_i32_1 = arith.constant 0 : i32
    return %arg1, %c0_i32, %c0_i32_0 : i32, i32, i32
  }
  func.func @transform_6(%arg0: i32, %arg1: i32) -> (i32, i32, i32) {
    %c0_i32 = arith.constant 0 : i32
    %c0_i32_0 = arith.constant 0 : i32
    %c0_i32_1 = arith.constant 0 : i32
    return %arg1, %c0_i32, %c0_i32_0 : i32, i32, i32
  }
  func.func @transform_7(%arg0: i32, %arg1: i32) -> (i32, i32, i32) {
    %c0_i32 = arith.constant 0 : i32
    %c0_i32_0 = arith.constant 0 : i32
    %c0_i32_1 = arith.constant 0 : i32
    return %arg1, %c0_i32, %c0_i32_0 : i32, i32, i32
  }
  func.func @transform_8(%arg0: i32, %arg1: i32) -> (i32, i32, i32) {
    %c0_i32 = arith.constant 0 : i32
    %c0_i32_0 = arith.constant 0 : i32
    %c0_i32_1 = arith.constant 0 : i32
    return %arg1, %c0_i32, %c0_i32_0 : i32, i32, i32
  }
  func.func @transform_9(%arg0: i32, %arg1: i32) -> (i32, i32, i32) {
    %c0_i32 = arith.constant 0 : i32
    %c0_i32_0 = arith.constant 0 : i32
    %c0_i32_1 = arith.constant 0 : i32
    return %arg1, %c0_i32, %c0_i32_0 : i32, i32, i32
  }
  func.func @transform_10(%arg0: i32, %arg1: i32) -> (i32, i32, i32) {
    %c0_i32 = arith.constant 0 : i32
    %c0_i32_0 = arith.constant 0 : i32
    %c0_i32_1 = arith.constant 0 : i32
    return %arg1, %c0_i32, %c0_i32_0 : i32, i32, i32
  }
  func.func @transform_11(%arg0: i32, %arg1: i32) -> (i32, i32, i32) {
    %c0_i32 = arith.constant 0 : i32
    %c0_i32_0 = arith.constant 0 : i32
    %c0_i32_1 = arith.constant 0 : i32
    return %arg1, %c0_i32, %c0_i32_0 : i32, i32, i32
  }
  func.func @transform_12(%arg0: i32, %arg1: i32) -> (i32, i32, i32) {
    %c0_i32 = arith.constant 0 : i32
    %c0_i32_0 = arith.constant 0 : i32
    %c0_i32_1 = arith.constant 0 : i32
    return %arg1, %c0_i32, %c0_i32_0 : i32, i32, i32
  }
  func.func @transform_13(%arg0: i32, %arg1: i32) -> (i32, i32) {
    %c0_i32 = arith.constant 0 : i32
    %c0_i32_0 = arith.constant 0 : i32
    %c0_i32_1 = arith.constant 0 : i32
    return %c0_i32, %c0_i32_0 : i32, i32
  }
  func.func @transform_14(%arg0: i32, %arg1: i32) -> (i32, i32) {
    %c0_i32 = arith.constant 0 : i32
    %c0_i32_0 = arith.constant 0 : i32
    %c0_i32_1 = arith.constant 0 : i32
    return %c0_i32, %c0_i32_0 : i32, i32
  }
  func.func @transform_15(%arg0: i32, %arg1: i32) -> (i32, i32) {
    %c0_i32 = arith.constant 0 : i32
    %c0_i32_0 = arith.constant 0 : i32
    %c0_i32_1 = arith.constant 0 : i32
    return %c0_i32, %c0_i32_0 : i32, i32
  }
  func.func @transform_16(%arg0: i32, %arg1: i32) -> (i32, i32) {
    %c0_i32 = arith.constant 0 : i32
    %c0_i32_0 = arith.constant 0 : i32
    %c0_i32_1 = arith.constant 0 : i32
    return %c0_i32, %c0_i32_0 : i32, i32
  }
  func.func @transform_17(%arg0: i32, %arg1: i32) -> (i32, i32, i32) {
    %c0_i32 = arith.constant 0 : i32
    %c0_i32_0 = arith.constant 0 : i32
    %c0_i32_1 = arith.constant 0 : i32
    return %arg0, %c0_i32, %c0_i32_0 : i32, i32, i32
  }
}

</mosaic_0001>

<bundles_post_ra>
// kernel: tpu_custom_call.1
= control target key start
LH: loop header
LB: loop body
LE: loop exit
PB: predicated region body
PF: predicated region fallthrough
CT: control target
= control target key end

     0   :  { %s3665_s0 = inlined_call_operand.hbm [shape: f32[2,8,32], index: 0, kind: input, shape index: {}]   ;;  %s3666_s1 = inlined_call_operand.hbm [shape: f32[8,8], index: 1, kind: input, shape index: {}]   ;;  %s3667_s2 = inlined_call_operand.hbm [shape: bf16[2,32,96], index: 2, kind: input, shape index: {}]   ;;  %s3668_s3 = inlined_call_operand.hbm [shape: bf16[2,4,8,32], index: 3, kind: input, shape index: {}]   ;;  %s3669_s4 = inlined_call_operand.vmem [shape: f32[2,1,32], index: 4, kind: input, shape index: {}]   ;;  %s3670_s5 = inlined_call_operand.vmem [shape: f32[2,1,32], index: 5, kind: input, shape index: {}]   ;;  %s3671_s6 = inlined_call_operand.vmem [shape: f32[2,1,32], index: 6, kind: input, shape index: {}]   ;;  %s3672_s7 = inlined_call_operand.hbm [shape: bf16[2,32,32], index: 7, kind: input, shape index: {}]   ;;  %s3673_s8 = inlined_call_operand.vmem [shape: f32[2,1,32], index: 8, kind: input, shape index: {}]   ;;  %s3674_s9 = inlined_call_operand.hbm [shape: bf16[2,32,32], index: 9, kind: input, shape index: {}]   ;;  %s3675_s10 = inlined_call_operand.vmem [shape: f32[2,1,32], index: 10, kind: input, shape index: {}]   ;;  %s3676_s11 = inlined_call_operand.hbm [shape: f32[2,1,32], index: 11, kind: input, shape index: {}]   ;;  %s3677_s12 = inlined_call_operand.hbm [shape: f32[2,1,32], index: 12, kind: input, shape index: {}]   ;;  %s3678_s13 = inlined_call_operand.vmem [shape: f32[1,32], index: 13, kind: input, shape index: {}]   ;;  %s3679_s14 = inlined_call_operand.hbm [shape: f32[1,32], index: 14, kind: input, shape index: {}]   ;;  %s3680_s15 = inlined_call_operand.vmem [shape: bf16[32,128], index: 15, kind: input, shape index: {}]   ;;  %s3681_s16 = inlined_call_operand.vmem [shape: f32[1,128], index: 16, kind: input, shape index: {}]   ;;  %s3682_s17 = inlined_call_operand.hbm [shape: f32[2,8,128], index: 17, kind: output, shape index: {}]  }
   0x1   :  { %3698 = sst [smem:[#allocation33_spill]] %s3665_s0 }
   0x2   :  { %3699 = sst [smem:[#allocation34_spill]] %s3666_s1 }
   0x3   :  { %3700 = sst [smem:[#allocation35_spill]] %s3667_s2 }
   0x4   :  { %3701 = sst [smem:[#allocation36_spill]] %s3668_s3 }
   0x5   :  { %3702 = sst [smem:[#allocation37_spill]] %s3669_s4 }
   0x6   :  { %3703 = sst [smem:[#allocation38_spill]] %s3670_s5 }
   0x7   :  { %3704 = sst [smem:[#allocation39_spill]] %s3671_s6 }
   0x8   :  { %3705 = sst [smem:[#allocation40_spill]] %s3672_s7 }
   0x9   :  { %3706 = sst [smem:[#allocation41_spill]] %s3673_s8 }
   0xa   :  { %3707 = sst [smem:[#allocation42_spill]] %s3674_s9 }
   0xb   :  { %3708 = sst [smem:[#allocation43_spill]] %s3675_s10 }
   0xc   :  { %3709 = sst [smem:[#allocation44_spill]] %s3676_s11 }
   0xd   :  { %3710 = sst [smem:[#allocation45_spill]] %s3677_s12 }
   0xe   :  { %3711 = sst [smem:[#allocation46_spill]] %s3678_s13 }
   0xf   :  { %3712 = sst [smem:[#allocation47_spill]] %s3679_s14 }
  0x10   :  { %3713 = sst [smem:[#allocation48_spill]] %s3680_s15 }
  0x11   :  { %3714 = sst [smem:[#allocation49_spill]] %s3681_s16 }
  0x12   :  { %3715 = sst [smem:[#allocation50_spill]] %s3682_s17 }
  0x13   :  { %22 = vsyncpa [#allocation4], 0 }
  0x14   :  { %24 = vsyncpa [#allocation4 + $0x1], 0 }
  0x15   :  { %25 = vsyncpa [#allocation7], 0 }
  0x16   :  { %26 = vsyncpa [#allocation5], 0 }
  0x17   :  { %28 = vsyncpa [#allocation5 + $0x1], 0  ;;  %s3081_s24 = smov 0   ;;  %s3083_s25 = smov 0  }
  0x18   :  { %s3085_s26 = smov 0   ;;  %s3087_s27 = smov 0  }
  0x19   :  { %s3089_s28 = smov 0   ;;  %s3091_s29 = smov 0  }
  0x1a   :  { %s3093_s0 = smov 0   ;;  %s3095_s30 = smov 0  }
  0x1b   :  { %s3097_s18 = smov 0   ;;  %s3099_s19 = smov 0  }
  0x1c   :  { %s3101_s1 = smov 0  }
  0x1d LB: > { %3716 = sst [smem:[#allocation21_spill]] %s2926_s25  ;;  %s2168_s20 = sadd.s32 4294967294, %s2962_s1   ;;  %s2962_s1 = sphi %s3101_s1, %s34_s1   ;;  %s2958_s19 = sphi %s3099_s19, %s3789_s19   ;;  %s2954_s18 = sphi %s3097_s18, %s3788_s18   ;;  %s2950_s30 = sphi %s3095_s30, %s3787_s30   ;;  %s2946_s0 = sphi %s3093_s0, %s3786_s0   ;;  %s2942_s29 = sphi %s3091_s29, %s3785_s29   ;;  %s2938_s28 = sphi %s3089_s28, %s3791_s28   ;;  %s2934_s27 = sphi %s3087_s27, %s3790_s27   ;;  %s2930_s26 = sphi %s3085_s26, %s3783_s26   ;;  %s2926_s25 = sphi %s3083_s25, %s3782_s25   ;;  %s2922_s24 = sphi %s3081_s24, %s3781_s24  }
  0x1e   : > { %3717 = sst [smem:[#allocation22_spill]] %s2930_s26  ;;  %s43_s21 = sadd.s32 1, %s2954_s18 }
  0x1f   : > { %3718 = sst [smem:[#allocation23_spill]] %s2942_s29  ;;  %p44_p0 = scmp.ge.s32.totalorder %s43_s21, 2 }
  0x20   : > { %3719 = sst [smem:[#allocation24_spill]] %s2946_s0  ;;  %s46_s22 = sadd.s32 1, %s2958_s19 }
  0x21   : > { %3720 = sst [smem:[#allocation25_spill]] %s2950_s30  ;;  %s53_s23 = sadd.s32 1, %s2942_s29 }
  0x22   : > { %3721 = sst [smem:[#allocation26_spill]] %s2954_s18  ;;  %p60_p1 = scmp.ne.s32.totalorder %s2942_s29, %s2938_s28 }
  0x23   : > { %3722 = sst [smem:[#allocation27_spill]] %s2958_s19  ;;  %s3793_s21 = smov (%p44_p0, %s43_s21), 0 }
  0x24   : > { %3723 = sst [smem:[#allocation28_spill]] %s3793_s21  ;;  %s3795_s22 = smov (!%p44_p0, %s46_s22), %s2958_s19 }
  0x25   : > { %p61_p2 = scmp.eq.s32.totalorder %s2962_s1, 0  ;;  %p66_p3 = scmp.ne.s32.totalorder %s2938_s28, %s2934_s27 }
  0x26   : > { %p48_p4 = scmp.ge.s32.totalorder %s3795_s22, 2  ;;  %s97_s17 = ssub.s32 %s2954_s18, %s3793_s21 }
  0x27   : > { %p3153_p5 = por %p61_p2, %p60_p1  ;;  %p98_p6 = scmp.eq.s32.totalorder %s97_s17, 0 }
  0x28   : > { %s3797_s22 = smov (%p48_p4, %s3795_s22), 0  ;;  %s100_s16 = sadd.s32 1, %s2930_s26 }
  0x29   : > { %3725 = sst [smem:[#allocation29_spill]] %s3797_s22  ;;  %p107_p7 = scmp.ne.s32.totalorder %s2930_s26, %s2926_s25 }
  0x2a   : > { %s50_s13 = ssub.s32 %s2958_s19, %s3797_s22  ;;  %p487_p8 = scmp.eq.s32.totalorder %s2168_s20, 3 }
  0x2b   : > { %p51_p9 = scmp.eq.s32.totalorder %s50_s13, 0  ;;  %p3164_p10 = por %p107_p7, %p61_p2 }
  0x2c   : > { %s3169_s21 = scalar_select %p98_p6, %s2930_s26, %s100_s16  }
  0x2d   : > { %s3172_s10 = scalar_select %p51_p9, %s2942_s29, %s53_s23  }
  0x2e   : > { %3727 = sst [smem:[#allocation30_spill]] %s3169_s21  ;;  %p3177_p11 = por %p487_p8, %p66_p3 }
  0x2f   : > { %3728 = sst [smem:[#allocation31_spill]] %s3172_s10  ;;  %p2441_p12 = scmp.lt.s32.totalorder %s2962_s1, 4 }
  0x30   : > { %s3729_s17 = scalar_select %p3177_p11, 1, 0 }
  0x31   : > { %s538_s8 = sand.u32 1, %s2962_s1   ;;  %s540_s22 = sand.u32 1, %s2942_s29  }
  0x32   : > { %3730 = sst [smem:[#allocation32_spill]] %s3729_s17  ;;  %s2173_s20 = sshll.u32 %s540_s22, 3 }
  0x33   : > { %s2174_s13 = sshll.u32 %s2958_s19, 7  ;;  %s3731_s4 = sld [smem:[#allocation33_spill]] }
  0x34   : > { %s542_s14 = scalar_lea.vmem [#allocation3], %s2173_s20  ;;  %p3190_p13 = pnand %p2441_p12, %p3153_p5 }
  0x35   : > { %s549_s12 = sshll.u32 %s542_s14, 4  ;;  %p3196_p0 = pnand %p2441_p12, %p3164_p10  ;;  %s550_s12 = int_to_ptr.vmem [resolvable:$true] %s549_s12 }
  0x36   : > { %s3201_s22 = sand.u32 1, %s2930_s26   ;;  %s3203_s19 = scalar_lea.sflag [#allocation4], %s538_s8 }
  0x37   : > { %p2584_p2 = pneg %p3190_p13  ;;  %s2964_s5 = smov [#allocation3]  }
  0x38   : > { %s2600_s6 = sshll.u32 %s2964_s5, 4  ;;  %s2601_s6 = int_to_ptr.vmem [resolvable:$false] %s2600_s6 }
  0x39   : > { %s547_s0 = scalar_lea.hbm %s3731_s4, %s2174_s13  ;;  %s2595_s4 = scalar_lea.vmem %s550_s12, 128 }
  0x3a   : > { %p2596_p4 = scmp.ne.s32.totalorder %s550_s12, %s2595_s4  ;;  %s2602_s14 = scalar_lea.vmem %s2601_s6, 256 }
  0x3b   : > { %p2603_p7 = scmp.lt.s32.totalorder %s550_s12, %s2601_s6  ;;  %p2604_p8 = scmp.lt.s32.totalorder %s2602_s14, %s2595_s4 }
  0x3c   : > { %p2598_p6 = pnand %p2596_p4, %p2584_p2 }
  0x3d   : > { %p2605_p9 = por %p2604_p8, %p2603_p7 }
  0x3e   : > { %p2599_p5 = pneg %p2598_p6 }
  0x40   : > { %p2606_p10 = pnand %p2605_p9, %p2599_p5 }
  0x42   : > { %2609 = shalt.err (!%p2606_p10)
}
  0x43   : > { %2416 = dma.hbm_to_vmem [thread:$0]  (!%p3190_p13), %s547_s0, 128, %s550_s12, %s3203_s19  }
  0x44   : > { %s3211_s8 = sshll.u32 %s3201_s22, 4  ;;  %s3214_s15 = sshll.u32 %s2954_s18, 8 }
  0x45   : > { %s3734_s2 = sld [smem:[#allocation35_spill]]  ;;  %s560_s4 = scalar_lea.vmem [#allocation8], %s3211_s8 }
  0x46   : > { %s567_s5 = sshll.u32 %s560_s4, 4  ;;  %p3223_p12 = pneg %p3196_p0  ;;  %s568_s5 = int_to_ptr.vmem [resolvable:$true] %s567_s5 }
  0x47   : > { %s2623_s12 = scalar_lea.vmem %s568_s5, 256  ;;  %s2965_s0 = smov [#allocation8]  }
  0x48   : > { %p2624_p13 = scmp.ne.s32.totalorder %s568_s5, %s2623_s12  ;;  %s2628_s6 = sshll.u32 %s2965_s0, 4  ;;  %s2629_s6 = int_to_ptr.vmem [resolvable:$false] %s2628_s6 }
  0x49   : > { %s2630_s14 = scalar_lea.vmem %s2629_s6, 512  ;;  %p2631_p6 = scmp.lt.s32.totalorder %s568_s5, %s2629_s6 }
  0x4a   : > { %p2626_p2 = pnand %p2624_p13, %p3223_p12  ;;  %p2632_p5 = scmp.lt.s32.totalorder %s2630_s14, %s2623_s12 }
  0x4b   : > { %s566_s13 = scalar_lea.hbm %s3734_s2, %s3214_s15 }
  0x4c   : > { %p2627_p4 = pneg %p2626_p2  ;;  %p2633_p7 = por %p2632_p5, %p2631_p6 }
  0x4e   : > { %p2634_p8 = pnand %p2633_p7, %p2627_p4 }
  0x50   : > { %2637 = shalt.err (!%p2634_p8)
}
  0x51   : > { %s2966_s30 = smov 64   ;;  %s2967_s20 = smov 4  }
  0x52   : > { %2419 = dma.hbm_to_vmem [thread:$0]  (!%p3196_p0), %s566_s13, 256, %s568_s5, %s3203_s19, %s2966_s30, %s2966_s30, %s2967_s20  }
  0x53   : > { %s3736_s3 = sld [smem:[#allocation36_spill]]  ;;  %s581_s12 = scalar_lea.vmem [#allocation9], %s3211_s8 }
  0x54   : > { %s588_s14 = sshll.u32 %s581_s12, 4  ;;  %s2968_s10 = smov [#allocation9]   ;;  %s589_s14 = int_to_ptr.vmem [resolvable:$true] %s588_s14 }
  0x55   : > { %s2651_s2 = scalar_lea.vmem %s589_s14, 256  ;;  %s2656_s21 = sshll.u32 %s2968_s10, 4  ;;  %s2657_s21 = int_to_ptr.vmem [resolvable:$false] %s2656_s21 }
  0x56   : > { %p2652_p9 = scmp.ne.s32.totalorder %s589_s14, %s2651_s2  ;;  %s2658_s26 = scalar_lea.vmem %s2657_s21, 512 }
  0x57   : > { %p2659_p2 = scmp.lt.s32.totalorder %s589_s14, %s2657_s21  ;;  %p2660_p4 = scmp.lt.s32.totalorder %s2658_s26, %s2651_s2 }
  0x58   : > { %p2654_p10 = pnand %p2652_p9, %p3223_p12 }
  0x59   : > { %s587_s6 = scalar_lea.hbm %s3736_s3, %s3214_s15  ;;  %p2661_p6 = por %p2660_p4, %p2659_p2 }
  0x5a   : > { %p2655_p13 = pneg %p2654_p10 }
  0x5c   : > { %p2662_p5 = pnand %p2661_p6, %p2655_p13 }
  0x5e   : > { %2665 = shalt.err (!%p2662_p5)
}
  0x5f   : > { %2422 = dma.hbm_to_vmem [thread:$0]  (!%p3196_p0), %s587_s6, 256, %s589_s14, %s3203_s19, %s2966_s30, %s2966_s30, %s2967_s20  }
  0x60   : > { %s3737_s7 = sld [smem:[#allocation40_spill]]  ;;  %s620_s4 = scalar_lea.vmem [#allocation10], %s3211_s8 }
  0x61   : > { %s627_s21 = sshll.u32 %s620_s4, 4  ;;  %s2969_s26 = smov [#allocation10]   ;;  %s628_s21 = int_to_ptr.vmem [resolvable:$true] %s627_s21 }
  0x62   : > { %s2679_s2 = scalar_lea.vmem %s628_s21, 256  ;;  %s2684_s0 = sshll.u32 %s2969_s26, 4  ;;  %s2685_s0 = int_to_ptr.vmem [resolvable:$false] %s2684_s0 }
  0x63   : > { %p2680_p7 = scmp.ne.s32.totalorder %s628_s21, %s2679_s2  ;;  %s2686_s12 = scalar_lea.vmem %s2685_s0, 512 }
  0x64   : > { %p2687_p10 = scmp.lt.s32.totalorder %s628_s21, %s2685_s0  ;;  %p2688_p13 = scmp.lt.s32.totalorder %s2686_s12, %s2679_s2 }
  0x65   : > { %p2682_p8 = pnand %p2680_p7, %p3223_p12 }
  0x66   : > { %s626_s10 = scalar_lea.hbm %s3737_s7, %s3214_s15  ;;  %p2689_p2 = por %p2688_p13, %p2687_p10 }
  0x67   : > { %p2683_p9 = pneg %p2682_p8 }
  0x69   : > { %p2690_p4 = pnand %p2689_p2, %p2683_p9 }
  0x6b   : > { %2693 = shalt.err (!%p2690_p4)
}
  0x6c   : > { %2425 = dma.hbm_to_vmem [thread:$0]  (!%p3196_p0), %s626_s10, 256, %s628_s21, %s3203_s19, %s2966_s30, %s2966_s30, %s2967_s20  }
  0x6d   : > { %s3738_s9 = sld [smem:[#allocation42_spill]]  ;;  %s647_s5 = scalar_lea.vmem [#allocation11], %s3211_s8 }
  0x6e   : > { %s654_s4 = sshll.u32 %s647_s5, 4  ;;  %s2970_s26 = smov [#allocation11]   ;;  %s655_s4 = int_to_ptr.vmem [resolvable:$true] %s654_s4 }
  0x6f   : > { %s2707_s2 = scalar_lea.vmem %s655_s4, 256  ;;  %s2712_s0 = sshll.u32 %s2970_s26, 4  ;;  %s2713_s0 = int_to_ptr.vmem [resolvable:$false] %s2712_s0 }
  0x70   : > { %p2708_p6 = scmp.ne.s32.totalorder %s655_s4, %s2707_s2  ;;  %s2714_s12 = scalar_lea.vmem %s2713_s0, 512 }
  0x71   : > { %p2715_p8 = scmp.lt.s32.totalorder %s655_s4, %s2713_s0  ;;  %p2716_p9 = scmp.lt.s32.totalorder %s2714_s12, %s2707_s2 }
  0x72   : > { %p2710_p5 = pnand %p2708_p6, %p3223_p12 }
  0x73   : > { %s653_s13 = scalar_lea.hbm %s3738_s9, %s3214_s15  ;;  %p2717_p10 = por %p2716_p9, %p2715_p8 }
  0x74   : > { %p2711_p7 = pneg %p2710_p5 }
  0x76   : > { %p2718_p13 = pnand %p2717_p10, %p2711_p7 }
  0x78   : > { %2721 = shalt.err (!%p2718_p13)
}
  0x79   : > { %2428 = dma.hbm_to_vmem [thread:$0]  (!%p3196_p0), %s653_s13, 256, %s655_s4, %s3203_s19, %s2966_s30, %s2966_s30, %s2967_s20  }
  0x7a   : > { %s3275_s8 = sadd.s32 4294967295, %s2962_s1   ;;  %p113_p4 = scmp.ne.s32.totalorder %s2926_s25, %s2922_s24 }
  0x7b   : > { %p3692_p2 = scmp.eq.s32.totalorder %s3275_s8, 0  ;;  %p481_p6 = scmp.eq.s32.totalorder %s3275_s8, 3 }
  0x7c   : > { %p2169_p5 = scmp.ge.s32.totalorder %s2962_s1, 1  ;;  %p494_p10 = scmp.lt.s32.totalorder %s2962_s1, 5 }
  0x7d   : > { %p3287_p7 = por %p3692_p2, %p66_p3  ;;  %p3293_p8 = por %p113_p4, %p3692_p2 }
  0x7e   : > { %p3300_p9 = por %p481_p6, %p60_p1  ;;  %p3305_p13 = pnand %p2169_p5, %p494_p10 }
  0x7f   : > { %s3740_s30 = scalar_select %p3293_p8, 1, 0 }
  0x80   : > { %s3741_s20 = scalar_select %p3300_p9, 1, 0 }
  0x81   : > { %s2971_s10 = smov [#allocation6]   ;;  %p2406_p3 = pneg %p3305_p13 }
  0x82   : > { %s507_s21 = sshll.u32 %s2971_s10, 4  ;;  %s2187_s6 = sshll.u32 %s2954_s18, 4  ;;  %s3309_s21 = int_to_ptr.vmem [resolvable:$true] %s507_s21 }
  0x83   : > { %s3743_s11 = sld [smem:[#allocation44_spill]]  ;;  %s673_s4 = scalar_lea.vmem [#allocation12], %s3201_s22 }
  0x84   : > { %s680_s2 = sshll.u32 %s673_s4, 4  ;;  %p3322_p1 = pnand %p2406_p3, %p3692_p2  ;;  %s681_s2 = int_to_ptr.vmem [resolvable:$true] %s680_s2 }
  0x85   : > { %s2735_s0 = scalar_lea.vmem %s681_s2, 16  ;;  %s2972_s12 = smov [#allocation12]  }
  0x86   : > { %p2736_p4 = scmp.ne.s32.totalorder %s681_s2, %s2735_s0  ;;  %s2740_s10 = sshll.u32 %s2972_s12, 4  ;;  %s2741_s10 = int_to_ptr.vmem [resolvable:$false] %s2740_s10 }
  0x87   : > { %s2742_s3 = scalar_lea.vmem %s2741_s10, 32  ;;  %p2743_p10 = scmp.lt.s32.totalorder %s681_s2, %s2741_s10 }
  0x88   : > { %p2738_p6 = pnand %p2736_p4, %p3223_p12  ;;  %p2744_p11 = scmp.lt.s32.totalorder %s2742_s3, %s2735_s0 }
  0x89   : > { %s678_s5 = scalar_lea.hbm %s3743_s11, %s2187_s6 }
  0x8a   : > { %p2739_p5 = pneg %p2738_p6  ;;  %p2745_p9 = por %p2744_p11, %p2743_p10 }
  0x8c   : > { %p2746_p8 = pnand %p2745_p9, %p2739_p5 }
  0x8e   : > { %2749 = shalt.err (!%p2746_p8)
}
  0x8f   : > { %2431 = dma.hbm_to_vmem [thread:$0]  (!%p3196_p0), %s678_s5, 16, %s681_s2, %s3203_s19  }
  0x90   : > { %p2752_p3 = pneg %p3322_p1  ;;  %s2761_s14 = scalar_lea.vmem %s3309_s21, 128 }
  0x91   : > { %p2762_p4 = scmp.ne.s32.totalorder %s3309_s21, %s2761_s14  ;;  %p2769_p11 = scmp.lt.s32.totalorder %s3309_s21, %s3309_s21 }
  0x92   : > { %p2770_p8 = scmp.lt.s32.totalorder %s2761_s14, %s2761_s14 }
  0x93   : > { %p2764_p6 = pnand %p2762_p4, %p2752_p3 }
  0x94   : > { %p2771_p9 = por %p2770_p8, %p2769_p11 }
  0x95   : > { %p2765_p2 = pneg %p2764_p6 }
  0x97   : > { %p2772_p5 = pnand %p2771_p9, %p2765_p2 }
  0x99   : > { %2775 = shalt.err (!%p2772_p5)
}
  0x9a   : > { %s3745_s5 = sld [smem:[#allocation34_spill]]  ;;  %s2973_s4 = smov [#allocation14]  }
  0x9b   : > { %s521_s2 = sshll.u32 %s2973_s4, 4  ;;  %s3746_s10 = sld [smem:[#allocation45_spill]]  ;;  %s522_s2 = int_to_ptr.vmem [resolvable:$true] %s521_s2 }
  0x9c   : > { %s2787_s7 = scalar_lea.vmem %s522_s2, 16  ;;  %s2794_s9 = scalar_lea.vmem %s522_s2, 32 }
  0x9d   : > { %p2788_p2 = scmp.ne.s32.totalorder %s522_s2, %s2787_s7  ;;  %p2795_p6 = scmp.lt.s32.totalorder %s522_s2, %s522_s2 }
  0x9e   : > { %p2796_p11 = scmp.lt.s32.totalorder %s2794_s9, %s2787_s7 }
  0x9f   : > { %p2790_p10 = pnand %p2788_p2, %p2752_p3 }
  0xa0   : > { %2409 = dma.hbm_to_vmem [thread:$0]  (!%p3322_p1), %s3745_s5, 128, %s3309_s21, [#allocation7]  }
  0xa1   : > { %s3351_s14 = scalar_lea.hbm %s3746_s10, %s2187_s6  ;;  %p2791_p4 = pneg %p2790_p10 }
  0xa2   : > { %p2797_p8 = por %p2796_p11, %p2795_p6 }
  0xa4   : > { %p2798_p9 = pnand %p2797_p8, %p2791_p4 }
  0xa6   : > { %2801 = shalt.err (!%p2798_p9)
}
  0xa7   : > { %s3747_s13 = sld [smem:[#allocation47_spill]]  ;;  %s690_s6 = scalar_lea.vmem [#allocation13], %s3201_s22 }
  0xa8   : > { %s697_s5 = sshll.u32 %s690_s6, 4  ;;  %s2974_s7 = smov [#allocation13]   ;;  %s698_s5 = int_to_ptr.vmem [resolvable:$true] %s697_s5 }
  0xa9   : > { %s2815_s4 = scalar_lea.vmem %s698_s5, 16  ;;  %s2820_s9 = sshll.u32 %s2974_s7, 4  ;;  %s2821_s9 = int_to_ptr.vmem [resolvable:$false] %s2820_s9 }
  0xaa   : > { %p2816_p3 = scmp.ne.s32.totalorder %s698_s5, %s2815_s4  ;;  %s2822_s0 = scalar_lea.vmem %s2821_s9, 32 }
  0xab   : > { %p2823_p10 = scmp.lt.s32.totalorder %s698_s5, %s2821_s9  ;;  %p2824_p4 = scmp.lt.s32.totalorder %s2822_s0, %s2815_s4 }
  0xac   : > { %p2818_p5 = pnand %p2816_p3, %p3223_p12 }
  0xad   : > { %2412 = dma.hbm_to_vmem [thread:$0]  (!%p3322_p1), %s3747_s13, 16, %s522_s2, [#allocation7]  }
  0xae   : > { %p2819_p2 = pneg %p2818_p5  ;;  %p2825_p6 = por %p2824_p4, %p2823_p10 }
  0xb0   : > { %p2826_p11 = pnand %p2825_p6, %p2819_p2 }
  0xb2   : > { %2829 = shalt.err (!%p2826_p11)
}
  0xb3   : > { %2434 = dma.hbm_to_vmem [thread:$0]  (!%p3196_p0), %s3351_s14, 16, %s698_s5, %s3203_s19  }
  0xb4   : > { %706 = sbr.rel (%p3305_p13) target bundleno = 4230 (0x1086), region = 88  ;;  %s708_s22 = sand.u32 (!%p3305_p13), 1, %s3275_s8  }
  0xb5   : > { %s3693_s16 = sand.u32 (!%p3305_p13), 1, %s2938_s28   ;;  %s709_s2 = scalar_lea.sflag (!%p3305_p13), [#allocation4], %s708_s22 }
  0xb6   : > { %s3374_s26 = sshll.u32 (!%p3305_p13), %s3693_s16, 3 }
  0xb7   : > { %s712_s12 = scalar_lea.vmem (!%p3305_p13), [#allocation3], %s3374_s26 }
  0xb9   : > { %2901 = dma.done.wait (%p3287_p7), %s709_s2, 128  }
  0xba   : > { %2903 = vsyncadd (%p3287_p7), %s709_s2, 4294967168  ;;  %p3748_p0 = scmp.eq.s32.totalorder %s3275_s8, 0 }
  0xbc   : > { %2905 = dma.done.wait (%p3748_p0), [#allocation7], 128   ;;  %p3749_p12 = pmov %p3748_p0 }
  0xbd   : > { %s3386_s19 = sand.u32 1, %s2926_s25   ;;  %p3750_p13 = scmp.ne.s32.totalorder %s3740_s30, 0 }
  0xbe   : > { %2907 = vsyncadd (%p3749_p12), [#allocation7], 4294967168  ;;  %s3389_s23 = sshll.u32 %s3386_s19, 4 }
  0xbf   : > { %s725_s24 = scalar_lea.vmem [#allocation8], %s3389_s23 }
  0xc0   : > { %2909 = dma.done.wait (%p3750_p13), %s709_s2, 1056  }
  0xc1   : > { %2911 = vsyncadd (%p3750_p13), %s709_s2, 4294966240  ;;  %s3397_s15 = scalar_lea.vmem [#allocation9], %s3389_s23  ;;  %p3751_p7 = pmov %p3748_p0 }
  0xc2   : > { %p3752_p1 = pmov %p3748_p0 }
  0xc3   : > { %2913 = dma.done.wait (%p3751_p7), [#allocation7], 16  }
  0xc4   : > { %2915 = vsyncadd (%p3752_p1), [#allocation7], 4294967280  ;;  %s3753_s13 = sld [smem:[#allocation24_spill]]  ;;  %s865_s17 = scalar_lea.vmem [#allocation15], %s3374_s26 }
  0xc5   : > { %s3754_s4 = sld [smem:[#allocation37_spill]] }
  0xc6   : > { %s3755_s22 = sld [smem:[#allocation38_spill]] }
  0xc7   : > { %s3756_s3 = sld [smem:[#allocation39_spill]] }
  0xc8   : > { %s3757_s11 = sld [smem:[#allocation41_spill]] }
  0xc9   : > { %s3758_s6 = sld [smem:[#allocation43_spill]] }
  0xca   : > { %p866_p8 = scmp.lt.s32.totalorder %s3753_s13, 1  ;;  %p2198_p9 = scmp.ne.s32.totalorder %s3753_s13, 0 }
  0xcc   : > { %s3409_s30 = scalar_select %p866_p8, %s3753_s13, 1 }
  0xcd   : > { %885 = sbr.rel (%p2198_p9) target bundleno = 212 (0xd4), region = 128 }
  0xce   : > { %s868_s7 = scalar_lea.vmem %s3754_s4, %s3409_s30  ;;  %s871_s8 = scalar_lea.vmem %s3755_s22, %s3409_s30 }
  0xcf   : > { %s874_s21 = scalar_lea.vmem %s3756_s3, %s3409_s30  ;;  %s877_s18 = scalar_lea.vmem %s3757_s11, %s3409_s30 }
  0xd0   : > { %s880_s5 = scalar_lea.vmem %s3758_s6, %s3409_s30 }
  0xd2   : > { %v886_v0 = vld [vmem:[%s712_s12] sm:$0xff]  ;;  %vm887_vm0 = vcmask 261120  }
  0xd3   : > { %888 = vst.msk [vmem:[#allocation2] sm:$0xff] %vm887_vm0, %v886_v0 }
  0xd4 PF: > { %v2552_v1 = vld [vmem:[%s725_s24 + $0x8] sm:$0xff]   ;;  %v2975_v2 = vmov 0.0   ;;  %v2553_v3 = vld [vmem:[%s725_s24] sm:$0xff]   ;;  %vm2976_vm1 = vmmov 0   ;;  %vm908_vm2 = vcmask 261120   ;;  %s2977_s11 = smov 120  }
  0xd5   : > { %2278 = vmatprep.subr.bf16.mxu0 %v2975_v2  ;;  %2286 = vmatprep.subr.bf16.mxu1 %v2975_v2  ;;  %s2978_s25 = smov 96   ;;  %s2979_s29 = smov 88   ;;  %vm960_vm3 = vcmask 64512   ;;  %v3464_v16 = vld [vmem:[#allocation6] sm:$0xff]  ;;  %vm1024_vm4 = vcmask 1043456  }
  0xd6   : > { %2279 = vmatpush3.bf16.msra.mxu0 %v2552_v1  ;;  %2282 = vmatprep.mubr.msk.bf16.mxu0 %vm2976_vm1, %v2975_v2  ;;  %s2980_s16 = smov 64   ;;  %s2981_s12 = smov 56   ;;  %v952_v51 = vld [vmem:[%s3397_s15] sm:$0xf]  ;;  %v953_v53 = vld [vmem:[%s3397_s15 + $0x4] sm:$0xf] }
  0xd7   : > { %2280 = vmatprep.subr.bf16.mxu0 %v2975_v2  ;;  %2288 = vmatprep.mubr.msk.bf16.mxu1 %vm2976_vm1, %v2975_v2  ;;  %s2982_s24 = smov 112   ;;  %s2983_s10 = smov 80   ;;  %v1230_v52 = vsel %vm1024_vm4, %v952_v51, 0  ;;  %v1184_v54 = vsel %vm1024_vm4, %v953_v53, 0 }
  0xd8   : > { %s2984_s14 = smov 72   ;;  %s2985_s3 = smov 104  }
  0xd9   : > { %s2986_s13 = smov 48   ;;  %s2987_s4 = smov 40  }
  0xda   : > { %v3437_v4 = vld [vmem:[#allocation2] sm:$0xff]  ;;  %2281 = vmatpush3.bf16.msra.mxu0 %v2553_v3  ;;  %s3770_s30 = sld [smem:[#allocation24_spill]] }
  0xdb   : > { %v891_v5 = vpack.c.bf16 %v3437_v4, %v3437_v4  ;;  %2292 = vmatprep.subr.bf16.mxu0 %v2975_v2 }
  0xdd   : > { %2283 = vmatmul.mubr.msk.bf16.vlgmr.msra.gmra.mxu0 %vm908_vm2, %v891_v5 }
  0xde   : > { %2294 = vmatprep.mubr.msk.bf16.mxu0 %vm2976_vm1, %v2975_v2 }
  0xe0   : > { %p2227_p3 = scmp.ne.s32.totalorder %s3770_s30, 1 }
 0x19d   : > { %v946_v6 = vpop.f32.mrf.mxu0 }
 0x19e   : > { %v3448_v7 = vpack.c.bf16 %v946_v6, %v946_v6 }
 0x19f   : > { %v2284_v8 = vpop.f32.mrf.mxu0 }
 0x1a0   : > { %1069 = vrot.lane.b32.xlu1 %v3448_v7, %s2977_s11  ;;  %958 = vrot.lane.b32.xlu0 %v3448_v7, %s2978_s25  ;;  %s3773_s11 = sld [smem:[#allocation49_spill]] (!%p2227_p3) }
 0x1a1   : > { %v949_v9 = vpop.f32.mrf.mxu0 }
 0x1a3   : > { %v2285_v10 = vpop.f32.mrf.mxu0 }
 0x1a4   : > { %1071 = vrot.lane.b32.xlu0 %v3448_v7, %s2979_s29 }
 0x212   : > { %v959_v11 = vpop.permute.xlu0 %958  ;;  %v1070_v15 = vpop.permute.xlu1 %1069 }
 0x213   : > { %v965_v12 = vsel %vm960_vm3, %v959_v11, 0 }
 0x214   : > { %2287 = vmatpush3.bf16.xpose.msra.mxu1 %v965_v12 }
 0x215   : > { %2298 = vmatprep.subr.bf16.mxu1 %v2975_v2 }
 0x216   : > { %v1072_v13 = vpop.permute.xlu0 %1071 }
 0x217   : > { %v1077_v14 = vsel %vm960_vm3, %v1072_v13, 0 }
 0x21b   : > { %2289 = vmatmul.mubr.msk.bf16.vlgmr.msra.gmra.mxu1 %vm960_vm3, %v3448_v7 }
 0x21c   : > { %2299 = vmatpush3.bf16.xpose.msra.mxu1 %v1077_v14  ;;  %2300 = vmatprep.mubr.msk.bf16.mxu1 %vm2976_vm1, %v2975_v2 }
 0x21d   : > { %2310 = vmatprep.subr.bf16.mxu1 %v2975_v2 }
 0x223   : > { %2301 = vmatmul.mubr.msk.bf16.vlgmr.msra.gmra.mxu1 %vm960_vm3, %v1070_v15 }
 0x224   : > { %2312 = vmatprep.mubr.msk.bf16.mxu1 %vm2976_vm1, %v2975_v2  ;;  %2311 = vmatpush3.bf16.msra.mxu1 %v1184_v54 }
 0x225   : > { %2322 = vmatprep.subr.bf16.mxu1 %v2975_v2 }
 0x2db   : > { %v1001_v17 = vpop.f32.mrf.mxu1 }
 0x2dc   : > { %v1002_v18 = vadd.f32 %v1001_v17, %v3464_v16 }
 0x2dd   : > { %v2290_v19 = vpop.f32.mrf.mxu1 }
 0x2de   : > { %v1007_v20 = vsel %vm960_vm3, %v1002_v18, -inf }
 0x2df   : > { %1008 = vmax.xlane.f32.xlu1 %v1007_v20  ;;  %v1004_v21 = vpop.f32.mrf.mxu1 }
 0x2e1   : > { %v2291_v22 = vpop.f32.mrf.mxu1 }
 0x2e3   : > { %v1113_v23 = vpop.f32.mrf.mxu1 }
 0x2e4   : > { %v1114_v24 = vadd.f32 %v1113_v23, %v3464_v16 }
 0x2e5   : > { %v2302_v25 = vpop.f32.mrf.mxu1 }
 0x2e6   : > { %v1119_v26 = vsel %vm960_vm3, %v1114_v24, -inf }
 0x2e7   : > { %1120 = vmax.xlane.f32.xlu0 %v1119_v26  ;;  %v1116_v27 = vpop.f32.mrf.mxu1 }
 0x2e9   : > { %v2303_v28 = vpop.f32.mrf.mxu1 }
 0x368   : > { %v1009_v29 = vpop.xlane.xlu1 %1008 }
 0x369   : > { %v1010_v30 = vsub.f32 %v1002_v18, %v1009_v29 }
 0x36b   : > { %v1011_v31 = vmul.f32 1.442695, %v1010_v30 }
 0x36d   : > { %2558 = vpow2.f32 %v1011_v31 }
 0x370   : > { %v1121_v32 = vpop.xlane.xlu0 %1120 }
 0x371   : > { %v1122_v33 = vsub.f32 %v1114_v24, %v1121_v32 }
 0x373   : > { %v1123_v34 = vmul.f32 1.442695, %v1122_v33 }
 0x375   : > { %2560 = vpow2.f32 %v1123_v34 }
 0x37a   : > { %v2559_v35 = vpop.eup %2558 }
 0x37b   : > { %v1013_v36 = vsel %vm960_vm3, %v2559_v35, 0.0 }
 0x37c   : > { %1014 = vadd.xlane.f32.xlu0 %v1013_v36 }
 0x382   : > { %v2561_v37 = vpop.eup %2560 }
 0x383   : > { %v1125_v38 = vsel %vm960_vm3, %v2561_v37, 0.0 }
 0x384   : > { %1126 = vadd.xlane.f32.xlu1 %v1125_v38 }
 0x392   : > { %1019 = vrot.lane.b32.xlu0 %v3448_v7, %s2980_s16 }
 0x395   : > { %1131 = vrot.lane.b32.xlu1 %v3448_v7, %s2981_s12  ;;  %s3764_s12 = scalar_lea.vmem [#allocation11], %s3389_s23 }
 0x396   : > { %1272 = vrot.lane.b32.xlu0 %v3448_v7, %s2982_s24  ;;  %s3765_s24 = smov %s3764_s12 }
 0x399   : > { %1274 = vrot.lane.b32.xlu1 %v3448_v7, %s2983_s10 }
 0x405   : > { %v1015_v39 = vpop.xlane.xlu0 %1014 }
 0x406   : > { %2562 = vrcp.f32 %v1015_v39 }
 0x409   : > { %v1020_v40 = vpop.permute.xlu0 %1019 }
 0x40a   : > { %v1026_v41 = vsel %vm1024_vm4, %v1020_v40, 0 }
 0x40b   : > { %2293 = vmatpush3.bf16.msra.mxu0 %v1026_v41 }
 0x40c   : > { %2304 = vmatprep.subr.bf16.mxu0 %v2975_v2 }
 0x40d   : > { %v1127_v42 = vpop.xlane.xlu1 %1126  ;;  %v1273_v5 = vpop.permute.xlu0 %1272 }
 0x40e   : > { %2564 = vrcp.f32 %v1127_v42 }
 0x411   : > { %v1132_v45 = vpop.permute.xlu1 %1131 }
 0x412   : > { %v1137_v47 = vsel %vm1024_vm4, %v1132_v45, 0 }
 0x413   : > { %v2563_v43 = vpop.eup %2562 }
 0x414   : > { %v1017_v44 = vmul.f32 %v2563_v43, %v2559_v35 }
 0x415   : > { %v1275_v60 = vpop.permute.xlu1 %1274 }
 0x416   : > { %v1018_v46 = vpack.c.bf16 %v1017_v44, %v1017_v44  ;;  %v1280_v0 = vsel %vm960_vm3, %v1275_v60, 0 }
 0x418   : > { %2295 = vmatmul.mubr.msk.bf16.vlgmr.msra.gmra.mxu0 %vm960_vm3, %v1018_v46 }
 0x419   : > { %2305 = vmatpush3.bf16.msra.mxu0 %v1137_v47  ;;  %2306 = vmatprep.mubr.msk.bf16.mxu0 %vm2976_vm1, %v2975_v2 }
 0x41a   : > { %2316 = vmatprep.subr.bf16.mxu0 %v2975_v2 }
 0x41b   : > { %v2565_v48 = vpop.eup %2564 }
 0x41c   : > { %v1129_v49 = vmul.f32 %v2565_v48, %v2561_v37  ;;  %v954_v37 = vld [vmem:[%s3397_s15 + $0x8] sm:$0xf] }
 0x41d   : > { %v1387_v38 = vsel %vm1024_vm4, %v954_v37, 0  ;;  %v2557_v37 = vld [vmem:[%s3765_s24] sm:$0xff]  }
 0x41e   : > { %v1130_v50 = vpack.c.bf16 %v1129_v49, %v1129_v49 }
 0x420   : > { %2307 = vmatmul.mubr.msk.bf16.vlgmr.msra.gmra.mxu0 %vm960_vm3, %v1130_v50 }
 0x421   : > { %2318 = vmatprep.mubr.msk.bf16.mxu0 %vm2976_vm1, %v2975_v2  ;;  %2317 = vmatpush3.bf16.msra.mxu0 %v1230_v52 }
 0x422   : > { %2328 = vmatprep.subr.bf16.mxu0 %v2975_v2 }
 0x4d8   : > { %v1062_v55 = vpop.f32.mrf.mxu0 }
 0x4d9   : > { %v1068_v56 = vpack.c.bf16 %v1062_v55, %v1062_v55 }
 0x4da   : > { %v2296_v57 = vpop.f32.mrf.mxu0 }
 0x4db   : > { %2319 = vmatmul.mubr.msk.bf16.vlgmr.msra.gmra.mxu0 %vm960_vm3, %v1068_v56 }
 0x4dc   : > { %v1065_v58 = vpop.f32.mrf.mxu0  ;;  %2330 = vmatprep.mubr.msk.bf16.mxu0 %vm2976_vm1, %v2975_v2 }
 0x4de   : > { %v2297_v59 = vpop.f32.mrf.mxu0 }
 0x4df   : > { %v955_v59 = vld [vmem:[%s3397_s15 + $0xc] sm:$0xf] }
 0x4e0   : > { %v1173_v61 = vpop.f32.mrf.mxu0 }
 0x4e1   : > { %v1179_v62 = vpack.c.bf16 %v1173_v61, %v1173_v61 }
 0x4e2   : > { %v2308_v63 = vpop.f32.mrf.mxu0 }
 0x4e3   : > { %2313 = vmatmul.mubr.msk.bf16.vlgmr.msra.gmra.mxu1 %vm960_vm3, %v1179_v62 }
 0x4e4   : > { %2323 = vmatpush3.bf16.xpose.msra.mxu1 %v1280_v0  ;;  %v1176_v1 = vpop.f32.mrf.mxu0  ;;  %2324 = vmatprep.mubr.msk.bf16.mxu1 %vm2976_vm1, %v2975_v2 }
 0x4e5   : > { %2334 = vmatprep.subr.bf16.mxu1 %v2975_v2 }
 0x4e6   : > { %v2309_v3 = vpop.f32.mrf.mxu0 }
 0x4eb   : > { %2325 = vmatmul.mubr.msk.bf16.vlgmr.msra.gmra.mxu1 %vm960_vm3, %v1273_v5 }
 0x4ec   : > { %2336 = vmatprep.mubr.msk.bf16.mxu1 %vm2976_vm1, %v2975_v2  ;;  %2335 = vmatpush3.bf16.msra.mxu1 %v1387_v38  ;;  %v2217_v38 = vld [vmem:[%s877_s18] ss:$0 sm:$0xff]  ;;  %s3768_s18 = scalar_lea.vmem [#allocation12], %s3386_s19 }
 0x4ed   : > { %2346 = vmatprep.subr.bf16.mxu1 %v2975_v2 }
 0x59b   : > { %v1266_v6 = vpop.f32.mrf.mxu0 }
 0x59d   : > { %v2320_v8 = vpop.f32.mrf.mxu0 }
 0x59f   : > { %v1269_v9 = vpop.f32.mrf.mxu0 }
 0x5a1   : > { %v2321_v10 = vpop.f32.mrf.mxu0 }
 0x5a3   : > { %v1220_v11 = vpop.f32.mrf.mxu1 }
 0x5a4   : > { %v3503_v12 = vadd.f32 %v1266_v6, %v1220_v11  ;;  %v2214_v11 = vld [vmem:[%s868_s7] ss:$0 sm:$0xff]  ;;  %s3760_s7 = scalar_lea.vmem [#allocation10], %s3389_s23  ;;  %s3769_s23 = scalar_lea.vmem [#allocation13], %s3386_s19 }
 0x5a5   : > { %v2314_v13 = vpop.f32.mrf.mxu1  ;;  %s3761_s22 = smov %s3760_s7 }
 0x5a7   : > { %v1223_v14 = vpop.f32.mrf.mxu1 }
 0x5a9   : > { %v2315_v15 = vpop.f32.mrf.mxu1 }
 0x5ab   : > { %v1316_v17 = vpop.f32.mrf.mxu1 }
 0x5ac   : > { %v1317_v18 = vadd.f32 %v1316_v17, %v3464_v16 }
 0x5ad   : > { %v2326_v19 = vpop.f32.mrf.mxu1 }
 0x5ae   : > { %v1322_v20 = vsel %vm960_vm3, %v1317_v18, -inf }
 0x5af   : > { %1323 = vmax.xlane.f32.xlu1 %v1322_v20  ;;  %v1319_v21 = vpop.f32.mrf.mxu1 }
 0x5b1   : > { %v2327_v22 = vpop.f32.mrf.mxu1 }
 0x5c0   : > { %1432 = vrot.lane.b32.xlu1 %v3448_v7, %s2984_s14 }
 0x5c4   : > { %1430 = vrot.lane.b32.xlu1 %v3448_v7, %s2985_s3 }
 0x638   : > { %v1324_v23 = vpop.xlane.xlu1 %1323 }
 0x639   : > { %v1325_v24 = vsub.f32 %v1317_v18, %v1324_v23 }
 0x63b   : > { %v1326_v25 = vmul.f32 1.442695, %v1325_v24 }
 0x63c   : > { %v1433_v33 = vpop.permute.xlu1 %1432 }
 0x63d   : > { %2566 = vpow2.f32 %v1326_v25  ;;  %v1438_v35 = vsel %vm960_vm3, %v1433_v33, 0  ;;  %v2554_v25 = vld [vmem:[%s3760_s7 + $0x8] sm:$0xff]  }
 0x640   : > { %v1431_v36 = vpop.permute.xlu1 %1430 }
 0x64a   : > { %v2567_v26 = vpop.eup %2566 }
 0x64b   : > { %v1328_v27 = vsel %vm960_vm3, %v2567_v26, 0.0 }
 0x64c   : > { %1329 = vadd.xlane.f32.xlu0 %v1328_v27 }
 0x662   : > { %1334 = vrot.lane.b32.xlu0 %v3448_v7, %s2986_s13 }
 0x6d5   : > { %v1330_v28 = vpop.xlane.xlu0 %1329 }
 0x6d6   : > { %2568 = vrcp.f32 %v1330_v28 }
 0x6d9   : > { %v1335_v29 = vpop.permute.xlu0 %1334 }
 0x6da   : > { %v1340_v30 = vsel %vm1024_vm4, %v1335_v29, 0 }
 0x6db   : > { %2329 = vmatpush3.bf16.msra.mxu0 %v1340_v30  ;;  %v2215_v30 = vld [vmem:[%s871_s8] ss:$0 sm:$0xff] }
 0x6dc   : > { %2340 = vmatprep.subr.bf16.mxu0 %v2975_v2 }
 0x6e3   : > { %v2569_v31 = vpop.eup %2568 }
 0x6e4   : > { %v1332_v32 = vmul.f32 %v2569_v31, %v2567_v26  ;;  %v2555_v26 = vld [vmem:[%s3761_s22] sm:$0xff]   ;;  %s3772_s22 = sld [smem:[#allocation46_spill]] (!%p2227_p3) }
 0x6e6   : > { %v1333_v34 = vpack.c.bf16 %v1332_v32, %v1332_v32  ;;  %v2216_v32 = vld [vmem:[%s874_s21] ss:$0 sm:$0xff] }
 0x6e8   : > { %2331 = vmatmul.mubr.msk.bf16.vlgmr.msra.gmra.mxu0 %vm960_vm3, %v1333_v34 }
 0x6e9   : > { %2341 = vmatpush3.bf16.xpose.msra.mxu0 %v1438_v35  ;;  %2342 = vmatprep.mubr.msk.bf16.mxu0 %vm2976_vm1, %v2975_v2 }
 0x6ea   : > { %2352 = vmatprep.subr.bf16.mxu0 %v2975_v2 }
 0x6f0   : > { %2343 = vmatmul.mubr.msk.bf16.vlgmr.msra.gmra.mxu0 %vm960_vm3, %v1431_v36  ;;  %v2556_v36 = vld [vmem:[%s3764_s12 + $0x8] sm:$0xff]  }
 0x6f1   : > { %2354 = vmatprep.mubr.msk.bf16.mxu0 %vm2976_vm1, %v2975_v2 }
 0x7a8   : > { %v1376_v39 = vpop.f32.mrf.mxu0 }
 0x7a9   : > { %v1382_v40 = vpack.c.bf16 %v1376_v39, %v1376_v39 }
 0x7aa   : > { %v2332_v41 = vpop.f32.mrf.mxu0 }
 0x7ab   : > { %2337 = vmatmul.mubr.msk.bf16.vlgmr.msra.gmra.mxu1 %vm960_vm3, %v1382_v40 }
 0x7ac   : > { %v1379_v42 = vpop.f32.mrf.mxu0  ;;  %2348 = vmatprep.mubr.msk.bf16.mxu1 %vm2976_vm1, %v2975_v2 }
 0x7ae   : > { %v2333_v43 = vpop.f32.mrf.mxu0 }
 0x7b0   : > { %v1474_v44 = vpop.f32.mrf.mxu0 }
 0x7b1   : > { %v1475_v45 = vadd.f32 %v1474_v44, %v3464_v16 }
 0x7b2   : > { %v2344_v46 = vpop.f32.mrf.mxu0 }
 0x7b3   : > { %v1480_v47 = vsel %vm960_vm3, %v1475_v45, -inf }
 0x7b4   : > { %1481 = vmax.xlane.f32.xlu0 %v1480_v47  ;;  %v1477_v48 = vpop.f32.mrf.mxu0 }
 0x7b6   : > { %v2345_v49 = vpop.f32.mrf.mxu0 }
 0x7ca   : > { %1492 = vrot.lane.b32.xlu0 %v3448_v7, %s2987_s4  ;;  %v1545_v7 = vsel %vm1024_vm4, %v955_v59, 0  ;;  %s3771_s4 = sld [smem:[#allocation48_spill]] (!%p2227_p3) }
 0x7cb   : > { %2353 = vmatpush3.bf16.msra.mxu0 %v1545_v7 }
 0x7cc   : > { %2366 = vmatprep.subr.bf16.mxu0 %v2975_v2 }
 0x83d   : > { %v1482_v50 = vpop.xlane.xlu0 %1481 }
 0x83e   : > { %v1483_v51 = vsub.f32 %v1475_v45, %v1482_v50 }
 0x840   : > { %v1484_v52 = vmul.f32 1.442695, %v1483_v51 }
 0x841   : > { %v1493_v53 = vpop.permute.xlu0 %1492 }
 0x842   : > { %2570 = vpow2.f32 %v1484_v52  ;;  %v1498_v54 = vsel %vm1024_vm4, %v1493_v53, 0 }
 0x843   : > { %2347 = vmatpush3.bf16.msra.mxu1 %v1498_v54 }
 0x844   : > { %2358 = vmatprep.subr.bf16.mxu1 %v2975_v2 }
 0x84f   : > { %v2571_v16 = vpop.eup %2570 }
 0x850   : > { %v1486_v55 = vsel %vm960_vm3, %v2571_v16, 0.0 }
 0x851   : > { %1487 = vadd.xlane.f32.xlu1 %v1486_v55 }
 0x86b   : > { %v1423_v56 = vpop.f32.mrf.mxu1 }
 0x86c   : > { %v1429_v57 = vadd.f32 %v1423_v56, %v3503_v12 }
 0x86d   : > { %v2338_v58 = vpop.f32.mrf.mxu1 }
 0x86f   : > { %v1426_v60 = vpop.f32.mrf.mxu1 }
 0x870   : > { %v2225_v60 = vld [vmem:[%s3768_s18] ss:$0 sm:$0xff] }
 0x871   : > { %v2339_v61 = vpop.f32.mrf.mxu1 }
 0x8da   : > { %v1488_v62 = vpop.xlane.xlu1 %1487 }
 0x8db   : > { %2572 = vrcp.f32 %v1488_v62  ;;  %v2226_v62 = vld [vmem:[%s3769_s23] ss:$0 sm:$0xff] }
 0x8e8   : > { %v2573_v63 = vpop.eup %2572 }
 0x8e9   : > { %v1490_v0 = vmul.f32 %v2573_v63, %v2571_v16 }
 0x8eb   : > { %v1491_v1 = vpack.c.bf16 %v1490_v0, %v1490_v0 }
 0x8ed   : > { %2349 = vmatmul.mubr.msk.bf16.vlgmr.msra.gmra.mxu1 %vm960_vm3, %v1491_v1 }
 0x8ee   : > { %2362 = vmatprep.mubr.msk.bf16.mxu1 %vm2976_vm1, %v2975_v2  ;;  %2359 = vmatpush3.bf16.msra.mxu1 %v2554_v25 }
 0x8ef   : > { %2360 = vmatprep.subr.bf16.mxu1 %v2975_v2 }
 0x8f2   : > { %2361 = vmatpush3.bf16.msra.mxu1 %v2555_v26 }
 0x9ad   : > { %v1534_v3 = vpop.f32.mrf.mxu1 }
 0x9ae   : > { %v1540_v5 = vpack.c.bf16 %v1534_v3, %v1534_v3 }
 0x9af   : > { %v2350_v6 = vpop.f32.mrf.mxu1 }
 0x9b0   : > { %2355 = vmatmul.mubr.msk.bf16.vlgmr.msra.gmra.mxu0 %vm960_vm3, %v1540_v5 }
 0x9b1   : > { %v1537_v8 = vpop.f32.mrf.mxu1  ;;  %2370 = vmatprep.mubr.msk.bf16.mxu0 %vm2976_vm1, %v2975_v2  ;;  %2367 = vmatpush3.bf16.msra.mxu0 %v2556_v36 }
 0x9b2   : > { %2368 = vmatprep.subr.bf16.mxu0 %v2975_v2  ;;  %v2221_v2 = vld [vmem:[%s880_s5] ss:$0 sm:$0xff] }
 0x9b3   : > { %v2351_v9 = vpop.f32.mrf.mxu1 }
 0x9b5   : > { %2369 = vmatpush3.bf16.msra.mxu0 %v2557_v37 }
 0xa70   : > { %v1581_v10 = vpop.f32.mrf.mxu0 }
 0xa71   : > { %v1587_v12 = vadd.f32 %v1581_v10, %v1429_v57 }
 0xa72   : > { %v2356_v13 = vpop.f32.mrf.mxu0 }
 0xa73   : > { %v1595_v14 = vadd.f32 %v2214_v11, %v1587_v12 }
 0xa74   : > { %v1584_v15 = vpop.f32.mrf.mxu0 }
 0xa75   : > { %v1596_v17 = vadd.f32 %v1595_v14, %v3437_v4 }
 0xa76   : > { %v2357_v18 = vpop.f32.mrf.mxu0 }
 0xa77   : > { %v1597_v19 = vsel %vm908_vm2, %v1596_v17, 0.0 }
 0xa78   : > { %1598 = vadd.xlane.f32.xlu1 %v1597_v19 }
 0xb01   : > { %v1599_v20 = vpop.xlane.xlu1 %1598 }
 0xb02   : > { %v1601_v21 = vmul.f32 0.03125, %v1599_v20 }
 0xb04   : > { %v1602_v22 = vsub.f32 %v1596_v17, %v1601_v21 }
 0xb06   : > { %v1603_v23 = vmul.f32 %v1602_v22, %v1602_v22 }
 0xb08   : > { %v1604_v24 = vsel %vm908_vm2, %v1603_v23, 0.0 }
 0xb09   : > { %1605 = vadd.xlane.f32.xlu1 %v1604_v24 }
 0xb92   : > { %v1606_v4 = vpop.xlane.xlu1 %1605 }
 0xb93   : > { %v1607_v27 = vmul.f32 0.03125, %v1606_v4 }
 0xb95   : > { %v1608_v28 = vadd.f32 1e-05, %v1607_v27 }
 0xb97   : > { %2574 = vrsqrt.f32 %v1608_v28 }
 0xba4   : > { %v2575_v29 = vpop.eup %2574 }
 0xba5   : > { %v1610_v31 = vmul.f32 %v2575_v29, %v1602_v22 }
 0xba7   : > { %v1618_v33 = vmul.f32 %v2215_v30, %v1610_v31 }
 0xba9   : > { %v1626_v34 = vadd.f32 %v2216_v32, %v1618_v33 }
 0xbab   : > { %v1627_v35 = vpack.c.bf16 %v1626_v34, %v1626_v34 }
 0xbad   : > { %2363 = vmatmul.mubr.msk.bf16.vlgmr.msra.gmra.mxu1 %vm908_vm2, %v1627_v35 }
 0xc6d   : > { %v1688_v39 = vpop.f32.mrf.mxu1 }
 0xc6e   : > { %v1689_v40 = vadd.f32 %v2217_v38, %v1688_v39 }
 0xc6f   : > { %v2364_v41 = vpop.f32.mrf.mxu1 }
 0xc70   : > { %v1694_v42 = vmax.f32 %v1689_v40, 0.0 }
 0xc71   : > { %v1691_v43 = vpop.f32.mrf.mxu1 }
 0xc72   : > { %v1695_v44 = vpack.c.bf16 %v1694_v42, %v1694_v42 }
 0xc73   : > { %v2365_v45 = vpop.f32.mrf.mxu1 }
 0xc74   : > { %2371 = vmatmul.mubr.msk.bf16.vlgmr.msra.gmra.mxu0 %vm908_vm2, %v1695_v44 }
 0xd34   : > { %v1756_v46 = vpop.f32.mrf.mxu0 }
 0xd35   : > { %v1757_v47 = vadd.f32 %v2221_v2, %v1756_v46 }
 0xd36   : > { %v2372_v48 = vpop.f32.mrf.mxu0 }
 0xd37   : > { %v1762_v49 = vadd.f32 %v1757_v47, %v1626_v34 }
 0xd38   : > { %v1759_v50 = vpop.f32.mrf.mxu0 }
 0xd39   : > { %v1763_v51 = vsel %vm908_vm2, %v1762_v49, 0.0 }
 0xd3a   : > { %1764 = vadd.xlane.f32.xlu1 %v1763_v51  ;;  %v2373_v52 = vpop.f32.mrf.mxu0 }
 0xdc3   : > { %v1765_v53 = vpop.xlane.xlu1 %1764 }
 0xdc4   : > { %v1766_v54 = vmul.f32 0.03125, %v1765_v53 }
 0xdc6   : > { %v1767_v16 = vsub.f32 %v1762_v49, %v1766_v54 }
 0xdc8   : > { %v1768_v55 = vmul.f32 %v1767_v16, %v1767_v16 }
 0xdca   : > { %v1769_v56 = vsel %vm908_vm2, %v1768_v55, 0.0 }
 0xdcb   : > { %1770 = vadd.xlane.f32.xlu1 %v1769_v56 }
 0xe54   : > { %v1771_v57 = vpop.xlane.xlu1 %1770 }
 0xe55   : > { %v1772_v58 = vmul.f32 0.03125, %v1771_v57 }
 0xe57   : > { %v1773_v59 = vadd.f32 1e-05, %v1772_v58 }
 0xe59   : > { %2576 = vrsqrt.f32 %v1773_v59 }
 0xe66   : > { %v2577_v7 = vpop.eup %2576 }
 0xe67   : > { %v1775_v61 = vmul.f32 %v2577_v7, %v1767_v16 }
 0xe69   : > { %v1783_v63 = vmul.f32 %v2225_v60, %v1775_v61  ;;  %1796 = sbr.rel (%p2227_p3) target bundleno = 4203 (0x106b), region = 132 }
 0xe6b   : > { %v1791_v0 = vadd.f32 %v2226_v62, %v1783_v63 }
 0xe6d   : > { %1792 = vst.msk [vmem:[#allocation2] sm:$0xff] %vm908_vm2, %v1791_v0 }
 0xe6e   : > { %v1797_v1 = vsel %vm908_vm2, %v1791_v0, 0.0  ;;  %v2578_v10 = vld [vmem:[%s3771_s4 + $0x8] sm:$0xff]   ;;  %v2988_v11 = vmov 0.0   ;;  %vm2989_vm5 = vmmov 0   ;;  %v2579_v12 = vld [vmem:[%s3771_s4] sm:$0xff]  }
 0xe6f   : > { %1798 = vadd.xlane.f32.xlu0 %v1797_v1  ;;  %2374 = vmatprep.subr.bf16.mxu0 %v2988_v11  ;;  %v2228_v18 = vld [vmem:[%s3772_s22] ss:$0 sm:$0xff]  ;;  %v2229_v20 = vld [vmem:[#allocation14] ss:$0 sm:$0xff] }
 0xe70   : > { %2378 = vmatprep.mubr.msk.bf16.mxu0 %vm2989_vm5, %v2988_v11  ;;  %2375 = vmatpush3.bf16.msra.mxu0 %v2578_v10  ;;  %v2230_v24 = vld [vmem:[%s3773_s11] ss:$0 sm:$0xff] }
 0xe71   : > { %2376 = vmatprep.subr.bf16.mxu0 %v2988_v11 }
 0xe74   : > { %2377 = vmatpush3.bf16.msra.mxu0 %v2579_v12 }
 0xef8   : > { %v1799_v3 = vpop.xlane.xlu0 %1798 }
 0xef9   : > { %v1800_v5 = vmul.f32 0.03125, %v1799_v3 }
 0xefb   : > { %v1801_v6 = vsub.f32 %v1791_v0, %v1800_v5 }
 0xefd   : > { %v1802_v8 = vmul.f32 %v1801_v6, %v1801_v6 }
 0xeff   : > { %v1803_v9 = vsel %vm908_vm2, %v1802_v8, 0.0 }
 0xf00   : > { %1804 = vadd.xlane.f32.xlu0 %v1803_v9 }
 0xf89   : > { %v1805_v13 = vpop.xlane.xlu0 %1804 }
 0xf8a   : > { %v1806_v14 = vmul.f32 0.03125, %v1805_v13 }
 0xf8c   : > { %v1807_v15 = vadd.f32 1e-05, %v1806_v14 }
 0xf8e   : > { %2580 = vrsqrt.f32 %v1807_v15 }
 0xf9b   : > { %v2581_v17 = vpop.eup %2580 }
 0xf9c   : > { %v1809_v19 = vmul.f32 %v2581_v17, %v1801_v6 }
 0xf9e   : > { %v1817_v21 = vmul.f32 %v2228_v18, %v1809_v19 }
 0xfa0   : > { %v1825_v22 = vadd.f32 %v2229_v20, %v1817_v21 }
 0xfa2   : > { %v1826_v23 = vpack.c.bf16 %v1825_v22, %v1825_v22 }
 0xfa4   : > { %2379 = vmatmul.mubr.msk.bf16.vlgmr.msra.gmra.mxu0 %vm908_vm2, %v1826_v23 }
0x1064   : > { %v1887_v25 = vpop.f32.mrf.mxu0 }
0x1065   : > { %v1888_v26 = vadd.f32 %v2230_v24, %v1887_v25 }
0x1066   : > { %v2380_v4 = vpop.f32.mrf.mxu0 }
0x1067   : > { %1893 = vst [vmem:[%s865_s17] sm:$0xff] %v1888_v26 }
0x1068   : > { %v1890_v27 = vpop.f32.mrf.mxu0 }
0x106a   : > { %v2381_v28 = vpop.f32.mrf.mxu0 }
0x106b PF: > { %s3774_s25 = sld [smem:[#allocation25_spill]]  ;;  %s1908_s14 = sshll.u32 %s865_s17, 4  ;;  %s1909_s14 = int_to_ptr.vmem [resolvable:$true] %s1908_s14 }
0x106c   : > { %s3775_s24 = sld [smem:[#allocation50_spill]]  ;;  %s3777_s21 = sand.u32 1, %s2938_s28  }
0x106d   : > { %s1895_s3 = scalar_lea.sflag [#allocation5], %s3777_s21  ;;  %s2830_s13 = scalar_lea.vmem %s1909_s14, 128 }
0x106e   : > { %p2831_p5 = scmp.ne.s32.totalorder %s1909_s14, %s2830_s13  ;;  %p3778_p2 = scmp.ne.s32.totalorder %s3741_s20, 0 }
0x106f   : > { %s2990_s18 = smov [#allocation15]  }
0x1070   : > { %p2832_p10 = pnand %p2831_p5, %p3778_p2  ;;  %s2834_s23 = sshll.u32 %s2990_s18, 4  ;;  %s2835_s23 = int_to_ptr.vmem [resolvable:$false] %s2834_s23 }
0x1071   : > { %s2235_s29 = sshll.u32 %s3774_s25, 7  ;;  %s2836_s30 = scalar_lea.vmem %s2835_s23, 256 }
0x1072   : > { %s3776_s8 = smov %s3775_s24  ;;  %s1906_s10 = scalar_lea.hbm %s3775_s24, %s2235_s29 }
0x1073   : > { %p2833_p4 = pneg %p2832_p10  ;;  %p2837_p6 = scmp.lt.s32.totalorder %s1909_s14, %s2835_s23 }
0x1074   : > { %p2838_p11 = scmp.lt.s32.totalorder %s2836_s30, %s2830_s13 }
0x1076   : > { %p2839_p0 = por %p2838_p11, %p2837_p6 }
0x1078   : > { %p2840_p12 = pnand %p2839_p0, %p2833_p4 }
0x107a   : > { %2843 = shalt.err (!%p2840_p12)
}
0x107b   : > { %s2844_s5 = scalar_lea.hbm %s1906_s10, 128  ;;  %s2848_s19 = scalar_lea.hbm %s3776_s8, 256 }
0x107c   : > { %p2845_p13 = scmp.ne.s32.totalorder %s1906_s10, %s2844_s5  ;;  %p2849_p8 = scmp.lt.s32.totalorder %s1906_s10, %s3776_s8 }
0x107d   : > { %p2850_p9 = scmp.lt.s32.totalorder %s2848_s19, %s2844_s5 }
0x107e   : > { %p2846_p7 = pnand %p2845_p13, %p3778_p2 }
0x107f   : > { %p2851_p3 = por %p2850_p9, %p2849_p8 }
0x1080   : > { %p2847_p1 = pneg %p2846_p7 }
0x1082   : > { %p2852_p5 = pnand %p2851_p3, %p2847_p1 }
0x1084   : > { %2855 = shalt.err (!%p2852_p5)
}
0x1085   : > { %2404 = dma.vmem_to_hbm [thread:$0]  (%p3778_p2), %s1909_s14, 128, %s1906_s10, %s1895_s3  }
0x1086 PF: > { %s3779_s0 = sld [smem:[#allocation32_spill]]  ;;  %p2444_p10 = scmp.ge.s32.totalorder %s2962_s1, 2 }
0x1087   : > { %s1920_s7 = sand.u32 1, %s2934_s27  }
0x1088   : > { %s1921_s22 = scalar_lea.sflag [#allocation5], %s1920_s7 }
0x108c   : > { %p3780_p4 = scmp.ne.s32.totalorder %s3779_s0, 0 }
0x108e   : > { %p2436_p6 = pnand %p2444_p10, %p3780_p4 }
0x1090   : > { %p2437_p11 = pneg %p2436_p6 }
0x1092   : > { %2917 = dma.done.wait (%p2437_p11), %s1921_s22, 128  }
0x1093   : > { %2919 = vsyncadd (%p2437_p11), %s1921_s22, 4294967168  ;;  %s34_s1 = sadd.s32 1, %s2962_s1   ;;  %s3781_s24 = sld [smem:[#allocation21_spill]] }
0x1094   : > { %p31_p0 = scmp.ge.s32.totalorder %s34_s1, 6   ;;  %s3782_s25 = sld [smem:[#allocation22_spill]] }
0x1095   : > { %s3783_s26 = sld [smem:[#allocation30_spill]]  ;;  %s3790_s27 = smov %s2938_s28 }
0x1096   : > { %s3784_s20 = sld [smem:[#allocation23_spill]] }
0x1097   : > { %s3785_s29 = sld [smem:[#allocation31_spill]] }
0x1098   : > { %s3786_s0 = sld [smem:[#allocation26_spill]]  ;;  %33 = sbr.rel (!%p31_p0) target bundleno = 29 (0x1d), region = 230 }
0x1099   : > { %s3787_s30 = sld [smem:[#allocation27_spill]] }
0x109a   : > { %s3788_s18 = sld [smem:[#allocation28_spill]] }
0x109b   : > { %s3789_s19 = sld [smem:[#allocation29_spill]] }
0x109c   : > { %s3791_s28 = smov %s3784_s20 }
0x109d   :  { %1926 = vsyncpa [#allocation4], 1 }
0x109e   :  { %1928 = vsyncpa [#allocation4 + $0x1], 1 }
0x109f   :  { %1929 = vsyncpa [#allocation7], 1 }
0x10a0   :  { %1930 = vsyncpa [#allocation5], 1 }
0x10a1   :  { %1932 = vsyncpa [#allocation5 + $0x1], 1 }

</bundles_post_ra>
